<compile_context>
chip_gen: v7x
topology: tpu7x:2x2x1
jax: 0.10.0
libtpu: 0.0.40
codegen_flags: <defaults>
</compile_context>

<pallas_src>
import jax
import jax.numpy as jnp
from jax.experimental import pallas as pl
from jax.experimental.pallas import tpu as pltpu


def _clip_embedding_kernel(tok_ref, emb_hbm, pos_ref, out_ref, row_buf, sems):
    # tok_ref : SMEM (B, T) int32        scalar-prefetched token ids
    # emb_hbm : HBM  (V, E) table dtype  full embedding table (row-gathered)
    # pos_ref : VMEM (T_tile, E)         positional slice for this T-chunk
    # out_ref : VMEM (T_tile, E)         per-(chunk, batch) output block
    # row_buf : VMEM (2, T_tile, E)      double-buffered gathered rows
    # sems    : DMA semaphores (2,)      one per buffer slot
    tc = pl.program_id(0)
    b = pl.program_id(1)
    nb = pl.num_programs(1)
    T_tile, E = out_ref.shape
    V = emb_hbm.shape[0]
    base = tc * T_tile

    def issue_rows(b_idx, slot):
        # Fully unrolled: T_tile is static, so the scalar token load, clamp and
        # DMA-descriptor push for every row co-issue across tokens.
        for t in range(T_tile):
            tok_id = jnp.clip(tok_ref[b_idx, base + t], 0, V - 1)
            pltpu.make_async_copy(
                emb_hbm.at[pl.ds(tok_id, 1), :],
                row_buf.at[slot, pl.ds(t, 1), :],
                sems.at[slot],
            ).start()

    slot = b & 1

    # First step of each batch chain gathers its own rows.
    @pl.when(b == 0)
    def _():
        issue_rows(0, 0)

    # Prefetch the next batch element's rows into the other slot *before*
    # waiting on ours — hides the DMA round trip across grid steps.
    @pl.when(b + 1 < nb)
    def _():
        issue_rows(b + 1, 1 - slot)

    # Single combined wait: all T_tile row copies into this slot signal
    # sems[slot]; a descriptor covering the whole (T_tile, E) slot has exactly
    # the same total byte count (same dtype, same rows), so one wait drains
    # them all.  Keep this descriptor's shape/dtype tied to the issued copies.
    pltpu.make_async_copy(
        emb_hbm.at[pl.ds(0, T_tile), :],
        row_buf.at[slot],
        sems.at[slot],
    ).wait()

    # Positional add on the VPU in f32; lane-dense (E is the last dim) store.
    x = row_buf[slot].astype(jnp.float32) + pos_ref[...].astype(jnp.float32)
    out_ref[...] = x.astype(out_ref.dtype)


def clip_embedding(tokens, token_embedding, position_embedding, *, t_chunks=None):
    """tokens: (B, T) int; token_embedding: (V, E); position_embedding: (T, E)."""
    B, T = tokens.shape
    V, E = token_embedding.shape
    assert position_embedding.shape == (T, E)

    if t_chunks is None:
        # Use 2 T-chunks (feeds both v7x TensorCores even at B=1) when T splits
        # into sublane-aligned halves; otherwise a single full-T chunk.
        t_chunks = 2 if (T % 16 == 0) else 1
    assert T % t_chunks == 0
    T_tile = T // t_chunks
    assert T_tile == T or T_tile % 8 == 0, "T chunk must be sublane-aligned"
    assert V >= T_tile, "combined-wait descriptor needs V >= T_tile"

    table_dtype = token_embedding.dtype
    out_dtype = jnp.result_type(table_dtype, position_embedding.dtype)
    tokens_i32 = tokens.astype(jnp.int32)

    # Memory-bound gather: ~B*T*E read + B*T*E write + positional table + ids.
    cost = pl.CostEstimate(
        flops=B * T * E,  # just the positional add
        transcendentals=0,
        bytes_accessed=(
            B * T * E * jnp.dtype(table_dtype).itemsize
            + B * T * E * jnp.dtype(out_dtype).itemsize
            + T * E * jnp.dtype(position_embedding.dtype).itemsize
            + B * T * 4
        ),
    )

    grid_spec = pltpu.PrefetchScalarGridSpec(
        num_scalar_prefetch=1,  # token ids -> SMEM, passed first to the kernel
        grid=(t_chunks, B),
        in_specs=[
            pl.BlockSpec(memory_space=pl.ANY),                       # table stays in HBM
            pl.BlockSpec((T_tile, E), lambda tc, b, tok: (tc, 0)),   # positional slice
        ],
        out_specs=pl.BlockSpec(
            (pl.Squeezed(), T_tile, E), lambda tc, b, tok: (b, tc, 0)
        ),
        scratch_shapes=[
            pltpu.VMEM((2, T_tile, E), table_dtype),  # double-buffered gathered rows
            pltpu.SemaphoreType.DMA((2,)),            # one shared semaphore per slot
        ],
    )

    return pl.pallas_call(
        _clip_embedding_kernel,
        out_shape=jax.ShapeDtypeStruct((B, T, E), out_dtype),
        grid_spec=grid_spec,
        compiler_params=pltpu.CompilerParams(
            # T-chunk axis feeds both v7x cores; batch axis is sequential so the
            # cross-step prefetch chain (slot b&1) is always valid.
            dimension_semantics=("parallel", "arbitrary"),
        ),
        cost_estimate=cost,
    )(tokens_i32, token_embedding, position_embedding)


if __name__ == "__main__":
    # Small deterministic config consistent with CLIPEmbedding(n_vocab, n_embd, n_tokens).
    # E is lane-dense (multiple of 128); T splits into two sublane-aligned chunks.
    n_vocab, n_embd, n_tokens = 1000, 128, 16
    batch = 2

    key = jax.random.PRNGKey(0)
    k_tok, k_emb, k_pos = jax.random.split(key, 3)

    tokens = jax.random.randint(k_tok, (batch, n_tokens), 0, n_vocab, dtype=jnp.int32)
    token_embedding = jax.random.normal(k_emb, (n_vocab, n_embd), dtype=jnp.float32)
    # nn.Parameter(torch.zeros(...)) in __init__; random here so the add path is exercised.
    position_embedding = 0.02 * jax.random.normal(
        k_pos, (n_tokens, n_embd), dtype=jnp.float32
    )

    out = clip_embedding(tokens, token_embedding, position_embedding)
    out = jax.block_until_ready(out)

    # Pure-JAX reference: x = token_embedding[tokens]; x += position_embedding
    ref = token_embedding[tokens] + position_embedding[None, :, :]
    assert out.shape == (batch, n_tokens, n_embd)
    assert jnp.allclose(out, ref, atol=1e-5, rtol=1e-5)

    print("KERNEL_OK")
</pallas_src>

<mosaic_0001>
module attributes {stable_mosaic.version = 11 : i64} {
  func.func @_clip_embedding_kernel(%arg0: i32, %arg1: i32, %arg2: memref<2x16xi32, #tpu.memory_space<smem>>, %arg3: memref<1000x128xf32, #tpu.memory_space<any>>, %arg4: memref<8x128xf32, #tpu.memory_space<vmem>>, %arg5: memref<1x8x128xf32, #tpu.memory_space<vmem>>, %arg6: memref<2x8x128xf32, #tpu.memory_space<vmem>>, %arg7: memref<2x!tpu.dma_semaphore, #tpu.memory_space<semaphore_mem>>) attributes {dimension_semantics = [#tpu.dimension_semantics<parallel>, #tpu.dimension_semantics<arbitrary>], iteration_bounds = array<i64: 2, 2>, scalar_prefetch = 1 : i64, scratch_operands = 2 : i64, tpu.core_type = #tpu.core_type<tc>, window_params = [{}, {transform_indices = @transform_1, window_bounds = array<i64: 8, 128>}, {transform_indices = @transform_2, window_bounds = array<i64: 1, 8, 128>}]} {
    %c8_i32 = arith.constant 8 : i32
    %0 = arith.muli %arg0, %c8_i32 : i32
    %c1_i32 = arith.constant 1 : i32
    %1 = arith.andi %arg1, %c1_i32 : i32
    %c0_i32 = arith.constant 0 : i32
    %2 = arith.cmpi eq, %arg1, %c0_i32 : i32
    %3 = arith.extui %2 : i1 to i32
    %c0_i32_0 = arith.constant 0 : i32
    %4 = arith.cmpi ne, %3, %c0_i32_0 : i32
    scf.if %4 {
      %c0_i32_13 = arith.constant 0 : i32
      %22 = arith.addi %0, %c0_i32_13 : i32
      %c0_14 = arith.constant 0 : index
      %23 = arith.index_cast %22 : i32 to index
      %24 = memref.load %arg2[%c0_14, %23] : memref<2x16xi32, #tpu.memory_space<smem>>
      %c0_i32_15 = arith.constant 0 : i32
      %c999_i32 = arith.constant 999 : i32
      %25 = arith.maxsi %c0_i32_15, %24 : i32
      %26 = arith.minsi %c999_i32, %25 : i32
      %c0_i32_16 = arith.constant 0 : i32
      %c0_i32_17 = arith.constant 0 : i32
      %c0_i32_18 = arith.constant 0 : i32
      %27 = tpu.memref_slice %arg3[%26, %c0_i32_18] : memref<1000x128xf32, #tpu.memory_space<any>> -> memref<1x128xf32, #tpu.memory_space<any>>
      %c0_i32_19 = arith.constant 0 : i32
      %c0_i32_20 = arith.constant 0 : i32
      %28 = tpu.memref_slice %arg6[%c0_i32_16, %c0_i32_19, %c0_i32_20] : memref<2x8x128xf32, #tpu.memory_space<vmem>> -> memref<1x1x128xf32, #tpu.memory_space<vmem>>
      %29 = tpu.memref_squeeze %28 : memref<1x1x128xf32, #tpu.memory_space<vmem>> -> memref<1x128xf32, #tpu.memory_space<vmem>>
      %30 = tpu.memref_slice %arg7[%c0_i32_17] : memref<2x!tpu.dma_semaphore, #tpu.memory_space<semaphore_mem>> -> memref<1x!tpu.dma_semaphore, #tpu.memory_space<semaphore_mem>>
      %31 = tpu.memref_squeeze %30 : memref<1x!tpu.dma_semaphore, #tpu.memory_space<semaphore_mem>> -> memref<!tpu.dma_semaphore, #tpu.memory_space<semaphore_mem>>
      tpu.enqueue_dma source(%27 : memref<1x128xf32, #tpu.memory_space<any>>) target(%29 : memref<1x128xf32, #tpu.memory_space<vmem>>) target_semaphore(%31 : memref<!tpu.dma_semaphore, #tpu.memory_space<semaphore_mem>>)
      %c1_i32_21 = arith.constant 1 : i32
      %32 = arith.addi %0, %c1_i32_21 : i32
      %c0_22 = arith.constant 0 : index
      %33 = arith.index_cast %32 : i32 to index
      %34 = memref.load %arg2[%c0_22, %33] : memref<2x16xi32, #tpu.memory_space<smem>>
      %c0_i32_23 = arith.constant 0 : i32
      %c999_i32_24 = arith.constant 999 : i32
      %35 = arith.maxsi %c0_i32_23, %34 : i32
      %36 = arith.minsi %c999_i32_24, %35 : i32
      %c0_i32_25 = arith.constant 0 : i32
      %c0_i32_26 = arith.constant 0 : i32
      %c0_i32_27 = arith.constant 0 : i32
      %37 = tpu.memref_slice %arg3[%36, %c0_i32_27] : memref<1000x128xf32, #tpu.memory_space<any>> -> memref<1x128xf32, #tpu.memory_space<any>>
      %c1_i32_28 = arith.constant 1 : i32
      %c0_i32_29 = arith.constant 0 : i32
      %38 = tpu.memref_slice %arg6[%c0_i32_25, %c1_i32_28, %c0_i32_29] : memref<2x8x128xf32, #tpu.memory_space<vmem>> -> memref<1x1x128xf32, #tpu.memory_space<vmem>>
      %39 = tpu.memref_squeeze %38 : memref<1x1x128xf32, #tpu.memory_space<vmem>> -> memref<1x128xf32, #tpu.memory_space<vmem>>
      %40 = tpu.memref_slice %arg7[%c0_i32_26] : memref<2x!tpu.dma_semaphore, #tpu.memory_space<semaphore_mem>> -> memref<1x!tpu.dma_semaphore, #tpu.memory_space<semaphore_mem>>
      %41 = tpu.memref_squeeze %40 : memref<1x!tpu.dma_semaphore, #tpu.memory_space<semaphore_mem>> -> memref<!tpu.dma_semaphore, #tpu.memory_space<semaphore_mem>>
      tpu.enqueue_dma source(%37 : memref<1x128xf32, #tpu.memory_space<any>>) target(%39 : memref<1x128xf32, #tpu.memory_space<vmem>>) target_semaphore(%41 : memref<!tpu.dma_semaphore, #tpu.memory_space<semaphore_mem>>)
      %c2_i32_30 = arith.constant 2 : i32
      %42 = arith.addi %0, %c2_i32_30 : i32
      %c0_31 = arith.constant 0 : index
      %43 = arith.index_cast %42 : i32 to index
      %44 = memref.load %arg2[%c0_31, %43] : memref<2x16xi32, #tpu.memory_space<smem>>
      %c0_i32_32 = arith.constant 0 : i32
      %c999_i32_33 = arith.constant 999 : i32
      %45 = arith.maxsi %c0_i32_32, %44 : i32
      %46 = arith.minsi %c999_i32_33, %45 : i32
      %c0_i32_34 = arith.constant 0 : i32
      %c0_i32_35 = arith.constant 0 : i32
      %c0_i32_36 = arith.constant 0 : i32
      %47 = tpu.memref_slice %arg3[%46, %c0_i32_36] : memref<1000x128xf32, #tpu.memory_space<any>> -> memref<1x128xf32, #tpu.memory_space<any>>
      %c2_i32_37 = arith.constant 2 : i32
      %c0_i32_38 = arith.constant 0 : i32
      %48 = tpu.memref_slice %arg6[%c0_i32_34, %c2_i32_37, %c0_i32_38] : memref<2x8x128xf32, #tpu.memory_space<vmem>> -> memref<1x1x128xf32, #tpu.memory_space<vmem>>
      %49 = tpu.memref_squeeze %48 : memref<1x1x128xf32, #tpu.memory_space<vmem>> -> memref<1x128xf32, #tpu.memory_space<vmem>>
      %50 = tpu.memref_slice %arg7[%c0_i32_35] : memref<2x!tpu.dma_semaphore, #tpu.memory_space<semaphore_mem>> -> memref<1x!tpu.dma_semaphore, #tpu.memory_space<semaphore_mem>>
      %51 = tpu.memref_squeeze %50 : memref<1x!tpu.dma_semaphore, #tpu.memory_space<semaphore_mem>> -> memref<!tpu.dma_semaphore, #tpu.memory_space<semaphore_mem>>
      tpu.enqueue_dma source(%47 : memref<1x128xf32, #tpu.memory_space<any>>) target(%49 : memref<1x128xf32, #tpu.memory_space<vmem>>) target_semaphore(%51 : memref<!tpu.dma_semaphore, #tpu.memory_space<semaphore_mem>>)
      %c3_i32 = arith.constant 3 : i32
      %52 = arith.addi %0, %c3_i32 : i32
      %c0_39 = arith.constant 0 : index
      %53 = arith.index_cast %52 : i32 to index
      %54 = memref.load %arg2[%c0_39, %53] : memref<2x16xi32, #tpu.memory_space<smem>>
      %c0_i32_40 = arith.constant 0 : i32
      %c999_i32_41 = arith.constant 999 : i32
      %55 = arith.maxsi %c0_i32_40, %54 : i32
      %56 = arith.minsi %c999_i32_41, %55 : i32
      %c0_i32_42 = arith.constant 0 : i32
      %c0_i32_43 = arith.constant 0 : i32
      %c0_i32_44 = arith.constant 0 : i32
      %57 = tpu.memref_slice %arg3[%56, %c0_i32_44] : memref<1000x128xf32, #tpu.memory_space<any>> -> memref<1x128xf32, #tpu.memory_space<any>>
      %c3_i32_45 = arith.constant 3 : i32
      %c0_i32_46 = arith.constant 0 : i32
      %58 = tpu.memref_slice %arg6[%c0_i32_42, %c3_i32_45, %c0_i32_46] : memref<2x8x128xf32, #tpu.memory_space<vmem>> -> memref<1x1x128xf32, #tpu.memory_space<vmem>>
      %59 = tpu.memref_squeeze %58 : memref<1x1x128xf32, #tpu.memory_space<vmem>> -> memref<1x128xf32, #tpu.memory_space<vmem>>
      %60 = tpu.memref_slice %arg7[%c0_i32_43] : memref<2x!tpu.dma_semaphore, #tpu.memory_space<semaphore_mem>> -> memref<1x!tpu.dma_semaphore, #tpu.memory_space<semaphore_mem>>
      %61 = tpu.memref_squeeze %60 : memref<1x!tpu.dma_semaphore, #tpu.memory_space<semaphore_mem>> -> memref<!tpu.dma_semaphore, #tpu.memory_space<semaphore_mem>>
      tpu.enqueue_dma source(%57 : memref<1x128xf32, #tpu.memory_space<any>>) target(%59 : memref<1x128xf32, #tpu.memory_space<vmem>>) target_semaphore(%61 : memref<!tpu.dma_semaphore, #tpu.memory_space<semaphore_mem>>)
      %c4_i32 = arith.constant 4 : i32
      %62 = arith.addi %0, %c4_i32 : i32
      %c0_47 = arith.constant 0 : index
      %63 = arith.index_cast %62 : i32 to index
      %64 = memref.load %arg2[%c0_47, %63] : memref<2x16xi32, #tpu.memory_space<smem>>
      %c0_i32_48 = arith.constant 0 : i32
      %c999_i32_49 = arith.constant 999 : i32
      %65 = arith.maxsi %c0_i32_48, %64 : i32
      %66 = arith.minsi %c999_i32_49, %65 : i32
      %c0_i32_50 = arith.constant 0 : i32
      %c0_i32_51 = arith.constant 0 : i32
      %c0_i32_52 = arith.constant 0 : i32
      %67 = tpu.memref_slice %arg3[%66, %c0_i32_52] : memref<1000x128xf32, #tpu.memory_space<any>> -> memref<1x128xf32, #tpu.memory_space<any>>
      %c4_i32_53 = arith.constant 4 : i32
      %c0_i32_54 = arith.constant 0 : i32
      %68 = tpu.memref_slice %arg6[%c0_i32_50, %c4_i32_53, %c0_i32_54] : memref<2x8x128xf32, #tpu.memory_space<vmem>> -> memref<1x1x128xf32, #tpu.memory_space<vmem>>
      %69 = tpu.memref_squeeze %68 : memref<1x1x128xf32, #tpu.memory_space<vmem>> -> memref<1x128xf32, #tpu.memory_space<vmem>>
      %70 = tpu.memref_slice %arg7[%c0_i32_51] : memref<2x!tpu.dma_semaphore, #tpu.memory_space<semaphore_mem>> -> memref<1x!tpu.dma_semaphore, #tpu.memory_space<semaphore_mem>>
      %71 = tpu.memref_squeeze %70 : memref<1x!tpu.dma_semaphore, #tpu.memory_space<semaphore_mem>> -> memref<!tpu.dma_semaphore, #tpu.memory_space<semaphore_mem>>
      tpu.enqueue_dma source(%67 : memref<1x128xf32, #tpu.memory_space<any>>) target(%69 : memref<1x128xf32, #tpu.memory_space<vmem>>) target_semaphore(%71 : memref<!tpu.dma_semaphore, #tpu.memory_space<semaphore_mem>>)
      %c5_i32 = arith.constant 5 : i32
      %72 = arith.addi %0, %c5_i32 : i32
      %c0_55 = arith.constant 0 : index
      %73 = arith.index_cast %72 : i32 to index
      %74 = memref.load %arg2[%c0_55, %73] : memref<2x16xi32, #tpu.memory_space<smem>>
      %c0_i32_56 = arith.constant 0 : i32
      %c999_i32_57 = arith.constant 999 : i32
      %75 = arith.maxsi %c0_i32_56, %74 : i32
      %76 = arith.minsi %c999_i32_57, %75 : i32
      %c0_i32_58 = arith.constant 0 : i32
      %c0_i32_59 = arith.constant 0 : i32
      %c0_i32_60 = arith.constant 0 : i32
      %77 = tpu.memref_slice %arg3[%76, %c0_i32_60] : memref<1000x128xf32, #tpu.memory_space<any>> -> memref<1x128xf32, #tpu.memory_space<any>>
      %c5_i32_61 = arith.constant 5 : i32
      %c0_i32_62 = arith.constant 0 : i32
      %78 = tpu.memref_slice %arg6[%c0_i32_58, %c5_i32_61, %c0_i32_62] : memref<2x8x128xf32, #tpu.memory_space<vmem>> -> memref<1x1x128xf32, #tpu.memory_space<vmem>>
      %79 = tpu.memref_squeeze %78 : memref<1x1x128xf32, #tpu.memory_space<vmem>> -> memref<1x128xf32, #tpu.memory_space<vmem>>
      %80 = tpu.memref_slice %arg7[%c0_i32_59] : memref<2x!tpu.dma_semaphore, #tpu.memory_space<semaphore_mem>> -> memref<1x!tpu.dma_semaphore, #tpu.memory_space<semaphore_mem>>
      %81 = tpu.memref_squeeze %80 : memref<1x!tpu.dma_semaphore, #tpu.memory_space<semaphore_mem>> -> memref<!tpu.dma_semaphore, #tpu.memory_space<semaphore_mem>>
      tpu.enqueue_dma source(%77 : memref<1x128xf32, #tpu.memory_space<any>>) target(%79 : memref<1x128xf32, #tpu.memory_space<vmem>>) target_semaphore(%81 : memref<!tpu.dma_semaphore, #tpu.memory_space<semaphore_mem>>)
      %c6_i32 = arith.constant 6 : i32
      %82 = arith.addi %0, %c6_i32 : i32
      %c0_63 = arith.constant 0 : index
      %83 = arith.index_cast %82 : i32 to index
      %84 = memref.load %arg2[%c0_63, %83] : memref<2x16xi32, #tpu.memory_space<smem>>
      %c0_i32_64 = arith.constant 0 : i32
      %c999_i32_65 = arith.constant 999 : i32
      %85 = arith.maxsi %c0_i32_64, %84 : i32
      %86 = arith.minsi %c999_i32_65, %85 : i32
      %c0_i32_66 = arith.constant 0 : i32
      %c0_i32_67 = arith.constant 0 : i32
      %c0_i32_68 = arith.constant 0 : i32
      %87 = tpu.memref_slice %arg3[%86, %c0_i32_68] : memref<1000x128xf32, #tpu.memory_space<any>> -> memref<1x128xf32, #tpu.memory_space<any>>
      %c6_i32_69 = arith.constant 6 : i32
      %c0_i32_70 = arith.constant 0 : i32
      %88 = tpu.memref_slice %arg6[%c0_i32_66, %c6_i32_69, %c0_i32_70] : memref<2x8x128xf32, #tpu.memory_space<vmem>> -> memref<1x1x128xf32, #tpu.memory_space<vmem>>
      %89 = tpu.memref_squeeze %88 : memref<1x1x128xf32, #tpu.memory_space<vmem>> -> memref<1x128xf32, #tpu.memory_space<vmem>>
      %90 = tpu.memref_slice %arg7[%c0_i32_67] : memref<2x!tpu.dma_semaphore, #tpu.memory_space<semaphore_mem>> -> memref<1x!tpu.dma_semaphore, #tpu.memory_space<semaphore_mem>>
      %91 = tpu.memref_squeeze %90 : memref<1x!tpu.dma_semaphore, #tpu.memory_space<semaphore_mem>> -> memref<!tpu.dma_semaphore, #tpu.memory_space<semaphore_mem>>
      tpu.enqueue_dma source(%87 : memref<1x128xf32, #tpu.memory_space<any>>) target(%89 : memref<1x128xf32, #tpu.memory_space<vmem>>) target_semaphore(%91 : memref<!tpu.dma_semaphore, #tpu.memory_space<semaphore_mem>>)
      %c7_i32 = arith.constant 7 : i32
      %92 = arith.addi %0, %c7_i32 : i32
      %c0_71 = arith.constant 0 : index
      %93 = arith.index_cast %92 : i32 to index
      %94 = memref.load %arg2[%c0_71, %93] : memref<2x16xi32, #tpu.memory_space<smem>>
      %c0_i32_72 = arith.constant 0 : i32
      %c999_i32_73 = arith.constant 999 : i32
      %95 = arith.maxsi %c0_i32_72, %94 : i32
      %96 = arith.minsi %c999_i32_73, %95 : i32
      %c0_i32_74 = arith.constant 0 : i32
      %c0_i32_75 = arith.constant 0 : i32
      %c0_i32_76 = arith.constant 0 : i32
      %97 = tpu.memref_slice %arg3[%96, %c0_i32_76] : memref<1000x128xf32, #tpu.memory_space<any>> -> memref<1x128xf32, #tpu.memory_space<any>>
      %c7_i32_77 = arith.constant 7 : i32
      %c0_i32_78 = arith.constant 0 : i32
      %98 = tpu.memref_slice %arg6[%c0_i32_74, %c7_i32_77, %c0_i32_78] : memref<2x8x128xf32, #tpu.memory_space<vmem>> -> memref<1x1x128xf32, #tpu.memory_space<vmem>>
      %99 = tpu.memref_squeeze %98 : memref<1x1x128xf32, #tpu.memory_space<vmem>> -> memref<1x128xf32, #tpu.memory_space<vmem>>
      %100 = tpu.memref_slice %arg7[%c0_i32_75] : memref<2x!tpu.dma_semaphore, #tpu.memory_space<semaphore_mem>> -> memref<1x!tpu.dma_semaphore, #tpu.memory_space<semaphore_mem>>
      %101 = tpu.memref_squeeze %100 : memref<1x!tpu.dma_semaphore, #tpu.memory_space<semaphore_mem>> -> memref<!tpu.dma_semaphore, #tpu.memory_space<semaphore_mem>>
      tpu.enqueue_dma source(%97 : memref<1x128xf32, #tpu.memory_space<any>>) target(%99 : memref<1x128xf32, #tpu.memory_space<vmem>>) target_semaphore(%101 : memref<!tpu.dma_semaphore, #tpu.memory_space<semaphore_mem>>)
    } else {
    }
    %c1_i32_1 = arith.constant 1 : i32
    %5 = arith.addi %arg1, %c1_i32_1 : i32
    %c2_i32 = arith.constant 2 : i32
    %6 = arith.cmpi slt, %5, %c2_i32 : i32
    %7 = arith.extui %6 : i1 to i32
    %c0_i32_2 = arith.constant 0 : i32
    %8 = arith.cmpi ne, %7, %c0_i32_2 : i32
    scf.if %8 {
      %c1_i32_13 = arith.constant 1 : i32
      %22 = arith.addi %arg1, %c1_i32_13 : i32
      %c1_i32_14 = arith.constant 1 : i32
      %23 = arith.subi %c1_i32_14, %1 : i32
      %c0_i32_15 = arith.constant 0 : i32
      %24 = arith.addi %0, %c0_i32_15 : i32
      %25 = arith.index_cast %22 : i32 to index
      %26 = arith.index_cast %24 : i32 to index
      %27 = memref.load %arg2[%25, %26] : memref<2x16xi32, #tpu.memory_space<smem>>
      %c0_i32_16 = arith.constant 0 : i32
      %c999_i32 = arith.constant 999 : i32
      %28 = arith.maxsi %c0_i32_16, %27 : i32
      %29 = arith.minsi %c999_i32, %28 : i32
      %c0_i32_17 = arith.constant 0 : i32
      %30 = tpu.memref_slice %arg3[%29, %c0_i32_17] : memref<1000x128xf32, #tpu.memory_space<any>> -> memref<1x128xf32, #tpu.memory_space<any>>
      %c0_i32_18 = arith.constant 0 : i32
      %c0_i32_19 = arith.constant 0 : i32
      %31 = tpu.memref_slice %arg6[%23, %c0_i32_18, %c0_i32_19] : memref<2x8x128xf32, #tpu.memory_space<vmem>> -> memref<1x1x128xf32, #tpu.memory_space<vmem>>
      %32 = tpu.memref_squeeze %31 : memref<1x1x128xf32, #tpu.memory_space<vmem>> -> memref<1x128xf32, #tpu.memory_space<vmem>>
      %33 = tpu.memref_slice %arg7[%23] : memref<2x!tpu.dma_semaphore, #tpu.memory_space<semaphore_mem>> -> memref<1x!tpu.dma_semaphore, #tpu.memory_space<semaphore_mem>>
      %34 = tpu.memref_squeeze %33 : memref<1x!tpu.dma_semaphore, #tpu.memory_space<semaphore_mem>> -> memref<!tpu.dma_semaphore, #tpu.memory_space<semaphore_mem>>
      tpu.enqueue_dma source(%30 : memref<1x128xf32, #tpu.memory_space<any>>) target(%32 : memref<1x128xf32, #tpu.memory_space<vmem>>) target_semaphore(%34 : memref<!tpu.dma_semaphore, #tpu.memory_space<semaphore_mem>>)
      %c1_i32_20 = arith.constant 1 : i32
      %35 = arith.addi %0, %c1_i32_20 : i32
      %36 = arith.index_cast %22 : i32 to index
      %37 = arith.index_cast %35 : i32 to index
      %38 = memref.load %arg2[%36, %37] : memref<2x16xi32, #tpu.memory_space<smem>>
      %c0_i32_21 = arith.constant 0 : i32
      %c999_i32_22 = arith.constant 999 : i32
      %39 = arith.maxsi %c0_i32_21, %38 : i32
      %40 = arith.minsi %c999_i32_22, %39 : i32
      %c0_i32_23 = arith.constant 0 : i32
      %41 = tpu.memref_slice %arg3[%40, %c0_i32_23] : memref<1000x128xf32, #tpu.memory_space<any>> -> memref<1x128xf32, #tpu.memory_space<any>>
      %c1_i32_24 = arith.constant 1 : i32
      %c0_i32_25 = arith.constant 0 : i32
      %42 = tpu.memref_slice %arg6[%23, %c1_i32_24, %c0_i32_25] : memref<2x8x128xf32, #tpu.memory_space<vmem>> -> memref<1x1x128xf32, #tpu.memory_space<vmem>>
      %43 = tpu.memref_squeeze %42 : memref<1x1x128xf32, #tpu.memory_space<vmem>> -> memref<1x128xf32, #tpu.memory_space<vmem>>
      %44 = tpu.memref_slice %arg7[%23] : memref<2x!tpu.dma_semaphore, #tpu.memory_space<semaphore_mem>> -> memref<1x!tpu.dma_semaphore, #tpu.memory_space<semaphore_mem>>
      %45 = tpu.memref_squeeze %44 : memref<1x!tpu.dma_semaphore, #tpu.memory_space<semaphore_mem>> -> memref<!tpu.dma_semaphore, #tpu.memory_space<semaphore_mem>>
      tpu.enqueue_dma source(%41 : memref<1x128xf32, #tpu.memory_space<any>>) target(%43 : memref<1x128xf32, #tpu.memory_space<vmem>>) target_semaphore(%45 : memref<!tpu.dma_semaphore, #tpu.memory_space<semaphore_mem>>)
      %c2_i32_26 = arith.constant 2 : i32
      %46 = arith.addi %0, %c2_i32_26 : i32
      %47 = arith.index_cast %22 : i32 to index
      %48 = arith.index_cast %46 : i32 to index
      %49 = memref.load %arg2[%47, %48] : memref<2x16xi32, #tpu.memory_space<smem>>
      %c0_i32_27 = arith.constant 0 : i32
      %c999_i32_28 = arith.constant 999 : i32
      %50 = arith.maxsi %c0_i32_27, %49 : i32
      %51 = arith.minsi %c999_i32_28, %50 : i32
      %c0_i32_29 = arith.constant 0 : i32
      %52 = tpu.memref_slice %arg3[%51, %c0_i32_29] : memref<1000x128xf32, #tpu.memory_space<any>> -> memref<1x128xf32, #tpu.memory_space<any>>
      %c2_i32_30 = arith.constant 2 : i32
      %c0_i32_31 = arith.constant 0 : i32
      %53 = tpu.memref_slice %arg6[%23, %c2_i32_30, %c0_i32_31] : memref<2x8x128xf32, #tpu.memory_space<vmem>> -> memref<1x1x128xf32, #tpu.memory_space<vmem>>
      %54 = tpu.memref_squeeze %53 : memref<1x1x128xf32, #tpu.memory_space<vmem>> -> memref<1x128xf32, #tpu.memory_space<vmem>>
      %55 = tpu.memref_slice %arg7[%23] : memref<2x!tpu.dma_semaphore, #tpu.memory_space<semaphore_mem>> -> memref<1x!tpu.dma_semaphore, #tpu.memory_space<semaphore_mem>>
      %56 = tpu.memref_squeeze %55 : memref<1x!tpu.dma_semaphore, #tpu.memory_space<semaphore_mem>> -> memref<!tpu.dma_semaphore, #tpu.memory_space<semaphore_mem>>
      tpu.enqueue_dma source(%52 : memref<1x128xf32, #tpu.memory_space<any>>) target(%54 : memref<1x128xf32, #tpu.memory_space<vmem>>) target_semaphore(%56 : memref<!tpu.dma_semaphore, #tpu.memory_space<semaphore_mem>>)
      %c3_i32 = arith.constant 3 : i32
      %57 = arith.addi %0, %c3_i32 : i32
      %58 = arith.index_cast %22 : i32 to index
      %59 = arith.index_cast %57 : i32 to index
      %60 = memref.load %arg2[%58, %59] : memref<2x16xi32, #tpu.memory_space<smem>>
      %c0_i32_32 = arith.constant 0 : i32
      %c999_i32_33 = arith.constant 999 : i32
      %61 = arith.maxsi %c0_i32_32, %60 : i32
      %62 = arith.minsi %c999_i32_33, %61 : i32
      %c0_i32_34 = arith.constant 0 : i32
      %63 = tpu.memref_slice %arg3[%62, %c0_i32_34] : memref<1000x128xf32, #tpu.memory_space<any>> -> memref<1x128xf32, #tpu.memory_space<any>>
      %c3_i32_35 = arith.constant 3 : i32
      %c0_i32_36 = arith.constant 0 : i32
      %64 = tpu.memref_slice %arg6[%23, %c3_i32_35, %c0_i32_36] : memref<2x8x128xf32, #tpu.memory_space<vmem>> -> memref<1x1x128xf32, #tpu.memory_space<vmem>>
      %65 = tpu.memref_squeeze %64 : memref<1x1x128xf32, #tpu.memory_space<vmem>> -> memref<1x128xf32, #tpu.memory_space<vmem>>
      %66 = tpu.memref_slice %arg7[%23] : memref<2x!tpu.dma_semaphore, #tpu.memory_space<semaphore_mem>> -> memref<1x!tpu.dma_semaphore, #tpu.memory_space<semaphore_mem>>
      %67 = tpu.memref_squeeze %66 : memref<1x!tpu.dma_semaphore, #tpu.memory_space<semaphore_mem>> -> memref<!tpu.dma_semaphore, #tpu.memory_space<semaphore_mem>>
      tpu.enqueue_dma source(%63 : memref<1x128xf32, #tpu.memory_space<any>>) target(%65 : memref<1x128xf32, #tpu.memory_space<vmem>>) target_semaphore(%67 : memref<!tpu.dma_semaphore, #tpu.memory_space<semaphore_mem>>)
      %c4_i32 = arith.constant 4 : i32
      %68 = arith.addi %0, %c4_i32 : i32
      %69 = arith.index_cast %22 : i32 to index
      %70 = arith.index_cast %68 : i32 to index
      %71 = memref.load %arg2[%69, %70] : memref<2x16xi32, #tpu.memory_space<smem>>
      %c0_i32_37 = arith.constant 0 : i32
      %c999_i32_38 = arith.constant 999 : i32
      %72 = arith.maxsi %c0_i32_37, %71 : i32
      %73 = arith.minsi %c999_i32_38, %72 : i32
      %c0_i32_39 = arith.constant 0 : i32
      %74 = tpu.memref_slice %arg3[%73, %c0_i32_39] : memref<1000x128xf32, #tpu.memory_space<any>> -> memref<1x128xf32, #tpu.memory_space<any>>
      %c4_i32_40 = arith.constant 4 : i32
      %c0_i32_41 = arith.constant 0 : i32
      %75 = tpu.memref_slice %arg6[%23, %c4_i32_40, %c0_i32_41] : memref<2x8x128xf32, #tpu.memory_space<vmem>> -> memref<1x1x128xf32, #tpu.memory_space<vmem>>
      %76 = tpu.memref_squeeze %75 : memref<1x1x128xf32, #tpu.memory_space<vmem>> -> memref<1x128xf32, #tpu.memory_space<vmem>>
      %77 = tpu.memref_slice %arg7[%23] : memref<2x!tpu.dma_semaphore, #tpu.memory_space<semaphore_mem>> -> memref<1x!tpu.dma_semaphore, #tpu.memory_space<semaphore_mem>>
      %78 = tpu.memref_squeeze %77 : memref<1x!tpu.dma_semaphore, #tpu.memory_space<semaphore_mem>> -> memref<!tpu.dma_semaphore, #tpu.memory_space<semaphore_mem>>
      tpu.enqueue_dma source(%74 : memref<1x128xf32, #tpu.memory_space<any>>) target(%76 : memref<1x128xf32, #tpu.memory_space<vmem>>) target_semaphore(%78 : memref<!tpu.dma_semaphore, #tpu.memory_space<semaphore_mem>>)
      %c5_i32 = arith.constant 5 : i32
      %79 = arith.addi %0, %c5_i32 : i32
      %80 = arith.index_cast %22 : i32 to index
      %81 = arith.index_cast %79 : i32 to index
      %82 = memref.load %arg2[%80, %81] : memref<2x16xi32, #tpu.memory_space<smem>>
      %c0_i32_42 = arith.constant 0 : i32
      %c999_i32_43 = arith.constant 999 : i32
      %83 = arith.maxsi %c0_i32_42, %82 : i32
      %84 = arith.minsi %c999_i32_43, %83 : i32
      %c0_i32_44 = arith.constant 0 : i32
      %85 = tpu.memref_slice %arg3[%84, %c0_i32_44] : memref<1000x128xf32, #tpu.memory_space<any>> -> memref<1x128xf32, #tpu.memory_space<any>>
      %c5_i32_45 = arith.constant 5 : i32
      %c0_i32_46 = arith.constant 0 : i32
      %86 = tpu.memref_slice %arg6[%23, %c5_i32_45, %c0_i32_46] : memref<2x8x128xf32, #tpu.memory_space<vmem>> -> memref<1x1x128xf32, #tpu.memory_space<vmem>>
      %87 = tpu.memref_squeeze %86 : memref<1x1x128xf32, #tpu.memory_space<vmem>> -> memref<1x128xf32, #tpu.memory_space<vmem>>
      %88 = tpu.memref_slice %arg7[%23] : memref<2x!tpu.dma_semaphore, #tpu.memory_space<semaphore_mem>> -> memref<1x!tpu.dma_semaphore, #tpu.memory_space<semaphore_mem>>
      %89 = tpu.memref_squeeze %88 : memref<1x!tpu.dma_semaphore, #tpu.memory_space<semaphore_mem>> -> memref<!tpu.dma_semaphore, #tpu.memory_space<semaphore_mem>>
      tpu.enqueue_dma source(%85 : memref<1x128xf32, #tpu.memory_space<any>>) target(%87 : memref<1x128xf32, #tpu.memory_space<vmem>>) target_semaphore(%89 : memref<!tpu.dma_semaphore, #tpu.memory_space<semaphore_mem>>)
      %c6_i32 = arith.constant 6 : i32
      %90 = arith.addi %0, %c6_i32 : i32
      %91 = arith.index_cast %22 : i32 to index
      %92 = arith.index_cast %90 : i32 to index
      %93 = memref.load %arg2[%91, %92] : memref<2x16xi32, #tpu.memory_space<smem>>
      %c0_i32_47 = arith.constant 0 : i32
      %c999_i32_48 = arith.constant 999 : i32
      %94 = arith.maxsi %c0_i32_47, %93 : i32
      %95 = arith.minsi %c999_i32_48, %94 : i32
      %c0_i32_49 = arith.constant 0 : i32
      %96 = tpu.memref_slice %arg3[%95, %c0_i32_49] : memref<1000x128xf32, #tpu.memory_space<any>> -> memref<1x128xf32, #tpu.memory_space<any>>
      %c6_i32_50 = arith.constant 6 : i32
      %c0_i32_51 = arith.constant 0 : i32
      %97 = tpu.memref_slice %arg6[%23, %c6_i32_50, %c0_i32_51] : memref<2x8x128xf32, #tpu.memory_space<vmem>> -> memref<1x1x128xf32, #tpu.memory_space<vmem>>
      %98 = tpu.memref_squeeze %97 : memref<1x1x128xf32, #tpu.memory_space<vmem>> -> memref<1x128xf32, #tpu.memory_space<vmem>>
      %99 = tpu.memref_slice %arg7[%23] : memref<2x!tpu.dma_semaphore, #tpu.memory_space<semaphore_mem>> -> memref<1x!tpu.dma_semaphore, #tpu.memory_space<semaphore_mem>>
      %100 = tpu.memref_squeeze %99 : memref<1x!tpu.dma_semaphore, #tpu.memory_space<semaphore_mem>> -> memref<!tpu.dma_semaphore, #tpu.memory_space<semaphore_mem>>
      tpu.enqueue_dma source(%96 : memref<1x128xf32, #tpu.memory_space<any>>) target(%98 : memref<1x128xf32, #tpu.memory_space<vmem>>) target_semaphore(%100 : memref<!tpu.dma_semaphore, #tpu.memory_space<semaphore_mem>>)
      %c7_i32 = arith.constant 7 : i32
      %101 = arith.addi %0, %c7_i32 : i32
      %102 = arith.index_cast %22 : i32 to index
      %103 = arith.index_cast %101 : i32 to index
      %104 = memref.load %arg2[%102, %103] : memref<2x16xi32, #tpu.memory_space<smem>>
      %c0_i32_52 = arith.constant 0 : i32
      %c999_i32_53 = arith.constant 999 : i32
      %105 = arith.maxsi %c0_i32_52, %104 : i32
      %106 = arith.minsi %c999_i32_53, %105 : i32
      %c0_i32_54 = arith.constant 0 : i32
      %107 = tpu.memref_slice %arg3[%106, %c0_i32_54] : memref<1000x128xf32, #tpu.memory_space<any>> -> memref<1x128xf32, #tpu.memory_space<any>>
      %c7_i32_55 = arith.constant 7 : i32
      %c0_i32_56 = arith.constant 0 : i32
      %108 = tpu.memref_slice %arg6[%23, %c7_i32_55, %c0_i32_56] : memref<2x8x128xf32, #tpu.memory_space<vmem>> -> memref<1x1x128xf32, #tpu.memory_space<vmem>>
      %109 = tpu.memref_squeeze %108 : memref<1x1x128xf32, #tpu.memory_space<vmem>> -> memref<1x128xf32, #tpu.memory_space<vmem>>
      %110 = tpu.memref_slice %arg7[%23] : memref<2x!tpu.dma_semaphore, #tpu.memory_space<semaphore_mem>> -> memref<1x!tpu.dma_semaphore, #tpu.memory_space<semaphore_mem>>
      %111 = tpu.memref_squeeze %110 : memref<1x!tpu.dma_semaphore, #tpu.memory_space<semaphore_mem>> -> memref<!tpu.dma_semaphore, #tpu.memory_space<semaphore_mem>>
      tpu.enqueue_dma source(%107 : memref<1x128xf32, #tpu.memory_space<any>>) target(%109 : memref<1x128xf32, #tpu.memory_space<vmem>>) target_semaphore(%111 : memref<!tpu.dma_semaphore, #tpu.memory_space<semaphore_mem>>)
    } else {
    }
    %c0_i32_3 = arith.constant 0 : i32
    %c0_i32_4 = arith.constant 0 : i32
    %9 = tpu.memref_slice %arg3[%c0_i32_3, %c0_i32_4] : memref<1000x128xf32, #tpu.memory_space<any>> -> memref<8x128xf32, #tpu.memory_space<any>>
    %c0_i32_5 = arith.constant 0 : i32
    %c0_i32_6 = arith.constant 0 : i32
    %10 = tpu.memref_slice %arg6[%1, %c0_i32_5, %c0_i32_6] : memref<2x8x128xf32, #tpu.memory_space<vmem>> -> memref<1x8x128xf32, #tpu.memory_space<vmem>>
    %11 = tpu.memref_squeeze %10 : memref<1x8x128xf32, #tpu.memory_space<vmem>> -> memref<8x128xf32, #tpu.memory_space<vmem>>
    %12 = tpu.memref_slice %arg7[%1] : memref<2x!tpu.dma_semaphore, #tpu.memory_space<semaphore_mem>> -> memref<1x!tpu.dma_semaphore, #tpu.memory_space<semaphore_mem>>
    %13 = tpu.memref_squeeze %12 : memref<1x!tpu.dma_semaphore, #tpu.memory_space<semaphore_mem>> -> memref<!tpu.dma_semaphore, #tpu.memory_space<semaphore_mem>>
    tpu.wait_dma2 semaphore(%13 : memref<!tpu.dma_semaphore, #tpu.memory_space<semaphore_mem>>) src(%9 : memref<8x128xf32, #tpu.memory_space<any>>) dst(%11 : memref<8x128xf32, #tpu.memory_space<vmem>>)
    %14 = arith.index_cast %1 : i32 to index
    %c0 = arith.constant 0 : index
    %c0_7 = arith.constant 0 : index
    %15 = vector.load %arg6[%14, %c0, %c0_7] : memref<2x8x128xf32, #tpu.memory_space<vmem>>, vector<1x8x128xf32>
    %16 = vector.shape_cast %15 : vector<1x8x128xf32> to vector<8x128xf32>
    %c0_8 = arith.constant 0 : index
    %c0_9 = arith.constant 0 : index
    %17 = vector.load %arg4[%c0_8, %c0_9] : memref<8x128xf32, #tpu.memory_space<vmem>>, vector<8x128xf32>
    %18 = arith.addf %16, %17 : vector<8x128xf32>
    %c0_10 = arith.constant 0 : index
    %c0_11 = arith.constant 0 : index
    %c0_12 = arith.constant 0 : index
    %19 = vector.load %arg5[%c0_10, %c0_11, %c0_12] : memref<1x8x128xf32, #tpu.memory_space<vmem>>, vector<1x8x128xf32>
    %20 = vector.shape_cast %19 : vector<1x8x128xf32> to vector<8x128xf32>
    %21 = vector.shape_cast %18 : vector<8x128xf32> to vector<1x8x128xf32>
    tpu.vector_store %arg5[%c0_10, %c0_11, %c0_12], %21 {strides = array<i32>} : memref<1x8x128xf32, #tpu.memory_space<vmem>>, vector<1x8x128xf32>,
    return
  }
  func.func @transform_1(%arg0: i32, %arg1: i32, %arg2: memref<2x16xi32, #tpu.memory_space<smem>>) -> (i32, i32) {
    %c0_i32 = arith.constant 0 : i32
    %c0_i32_0 = arith.constant 0 : i32
    return %arg0, %c0_i32 : i32, i32
  }
  func.func @transform_2(%arg0: i32, %arg1: i32, %arg2: memref<2x16xi32, #tpu.memory_space<smem>>) -> (i32, i32, i32) {
    %c0_i32 = arith.constant 0 : i32
    %c0_i32_0 = arith.constant 0 : i32
    return %arg1, %arg0, %c0_i32 : i32, i32, i32
  }
}

</mosaic_0001>

<bundles_post_ra>
// kernel: tpu_custom_call.1
= control target key start
LH: loop header
LB: loop body
LE: loop exit
PB: predicated region body
PF: predicated region fallthrough
CT: control target
= control target key end

     0   :  { %s2339_s0 = inlined_call_operand.hbm [shape: s32[2,16], index: 0, kind: input, shape index: {}]   ;;  %s2340_s1 = inlined_call_operand.hbm [shape: f32[1000,128], index: 1, kind: input, shape index: {}]   ;;  %s2341_s2 = inlined_call_operand.hbm [shape: f32[16,128], index: 2, kind: input, shape index: {}]   ;;  %s2342_s3 = inlined_call_operand.hbm [shape: f32[2,16,128], index: 3, kind: output, shape index: {}]  }
   0x1   :  { %2365 = sst [smem:[#allocation74_spill]] %s2341_s2  ;;  %s1028_s14 = scalar_lea.hbm %s2339_s0, 32 }
   0x2   :  { %2366 = sst [smem:[#allocation75_spill]] %s2342_s3  ;;  %p1029_p0 = scmp.ne.s32.totalorder %s2339_s0, %s1028_s14 }
   0x3   :  { %p1032_p1 = scmp.lt.u32.totalorder %s1028_s14, %s2339_s0 }
   0x5   :  { %p1034_p2 = pnand %p1032_p1, %p1029_p0 }
   0x7   :  { %1037 = shalt.err (!%p1034_p2)  }
   0x8   :  { %s1612_s19 = smov [#allocation5]  }
   0x9   :  { %9 = dma.hbm_to_smem %s2339_s0, 32, %s1612_s19, [#allocation4] }
   0xa   :  { %1556 = dma.done.wait [#allocation4], 32 }
   0xb   :  { %1557 = vsyncadd [#allocation4], 4294967264 }
   0xc   :  { %11 = sfence }
   0xd   :  { %12 = vsyncpa [#allocation7], 0 }
   0xe   :  { %14 = vsyncpa [#allocation7 + $0x1], 0 }
   0xf   :  { %15 = vsyncpa [#allocation8], 0 }
  0x10   :  { %17 = vsyncpa [#allocation8 + $0x1], 0  ;;  %s1655_s22 = smov 0   ;;  %s1657_s23 = smov 0  }
  0x11   :  { %s1659_s24 = smov 0   ;;  %s1661_s25 = smov 0  }
  0x12   :  { %s1663_s26 = smov 0   ;;  %s1665_s27 = smov 0  }
  0x13   :  { %s1667_s0 = smov 0   ;;  %s1669_s28 = smov 0  }
  0x14   :  { %s1671_s29 = smov 0   ;;  %s1673_s30 = smov 0  }
  0x15   :  { %s1675_s4 = smov 0  }
  0x16 LB: > { %2367 = sst [smem:[#allocation56_spill]] %s1570_s22  ;;  %s727_s5 = sadd.s32 4294967295, %s1610_s4   ;;  %s1610_s4 = sphi %s1675_s4, %s23_s4   ;;  %s1606_s30 = sphi %s1673_s30, %s2424_s30   ;;  %s1602_s29 = sphi %s1671_s29, %s2423_s29   ;;  %s1598_s28 = sphi %s1669_s28, %s2422_s28   ;;  %s1594_s0 = sphi %s1667_s0, %s2421_s0   ;;  %s1590_s27 = sphi %s1665_s27, %s2420_s27   ;;  %s1586_s26 = sphi %s1663_s26, %s2419_s26   ;;  %s1582_s25 = sphi %s1661_s25, %s2418_s25   ;;  %s1578_s24 = sphi %s1659_s24, %s2417_s24   ;;  %s1574_s23 = sphi %s1657_s23, %s2416_s23   ;;  %s1570_s22 = sphi %s1655_s22, %s2415_s22  }
  0x17   : > { %2368 = sst [smem:[#allocation57_spill]] %s1574_s23  ;;  %s728_s6 = sadd.s32 4294967294, %s1610_s4  }
  0x18   : > { %2369 = sst [smem:[#allocation58_spill]] %s1578_s24  ;;  %s32_s7 = sadd.s32 1, %s1602_s29 }
  0x19   : > { %2370 = sst [smem:[#allocation59_spill]] %s1586_s26  ;;  %s35_s8 = sadd.s32 1, %s1606_s30 }
  0x1a   : > { %2371 = sst [smem:[#allocation60_spill]] %s1590_s27  ;;  %p33_p3 = scmp.ge.s32.totalorder %s32_s7, 2 }
  0x1b   : > { %2372 = sst [smem:[#allocation61_spill]] %s1594_s0  ;;  %s42_s9 = sadd.s32 1, %s1590_s27 }
  0x1c   : > { %2373 = sst [smem:[#allocation62_spill]] %s1598_s28  ;;  %p49_p4 = scmp.ne.s32.totalorder %s1590_s27, %s1586_s26 }
  0x1d   : > { %2374 = sst [smem:[#allocation63_spill]] %s1602_s29  ;;  %p50_p5 = scmp.eq.s32.totalorder %s1610_s4, 0 }
  0x1e   : > { %2375 = sst [smem:[#allocation64_spill]] %s1606_s30  ;;  %s2426_s7 = smov (%p33_p3, %s32_s7), 0 }
  0x1f   : > { %2376 = sst [smem:[#allocation65_spill]] %s1610_s4  ;;  %s2428_s8 = smov (!%p33_p3, %s35_s8), %s1606_s30 }
  0x20   : > { %2377 = sst [smem:[#allocation66_spill]] %s2426_s7  ;;  %p1719_p6 = por %p50_p5, %p49_p4 }
  0x21   : > { %p55_p7 = scmp.ne.s32.totalorder %s1586_s26, %s1582_s25  ;;  %p37_p8 = scmp.ge.s32.totalorder %s2428_s8, 2 }
  0x22   : > { %p56_p9 = scmp.eq.s32.totalorder %s727_s5, 0  ;;  %s65_s11 = ssub.s32 %s1602_s29, %s2426_s7 }
  0x23   : > { %s70_s12 = sadd.s32 1, %s1578_s24  ;;  %s2430_s8 = smov (%p37_p8, %s2428_s8), 0 }
  0x24   : > { %2379 = sst [smem:[#allocation67_spill]] %s2430_s8  ;;  %p1729_p10 = por %p56_p9, %p55_p7 }
  0x25   : > { %p80_p11 = scmp.ne.s32.totalorder %s1578_s24, %s1574_s23  ;;  %s39_s14 = ssub.s32 %s1606_s30, %s2430_s8 }
  0x26   : > { %p81_p12 = scmp.eq.s32.totalorder %s727_s5, 3  ;;  %p40_p13 = scmp.eq.s32.totalorder %s39_s14, 0 }
  0x27   : > { %s67_s15 = sor.u32 %s65_s11, %s39_s14  ;;  %p86_p2 = scmp.ne.s32.totalorder %s1574_s23, %s1570_s22 }
  0x28   : > { %p68_p0 = scmp.eq.s32.totalorder %s67_s15, 0  ;;  %p1737_p1 = por %p81_p12, %p80_p11 }
  0x29   : > { %s1742_s17 = scalar_select %p40_p13, %s1590_s27, %s42_s9  }
  0x2a   : > { %s2381_s16 = scalar_select %p1737_p1, 1, 0 }
  0x2b   : > { %2383 = sst [smem:[#allocation69_spill]] %s1742_s17  ;;  %p87_p3 = scmp.eq.s32.totalorder %s728_s6, 3 }
  0x2c   : > { %2382 = sst [smem:[#allocation68_spill]] %s2381_s16  ;;  %p928_p4 = scmp.lt.s32.totalorder %s1610_s4, 4 }
  0x2d   : > { %s1745_s18 = scalar_select %p68_p0, %s1578_s24, %s70_s12  }
  0x2e   : > { %p1750_p5 = por %p87_p3, %p86_p2  ;;  %s107_s20 = sand.u32 1, %s1590_s27  }
  0x2f   : > { %2384 = sst [smem:[#allocation70_spill]] %s1745_s18  ;;  %s731_s21 = sshll.u32 %s107_s20, 3 }
  0x30   : > { %s2385_s19 = scalar_select %p1750_p5, 1, 0 }
  0x31   : > { %s732_s25 = sshll.u32 %s1606_s30, 7  ;;  %s2387_s2 = sld [smem:[#allocation74_spill]] }
  0x32   : > { %2386 = sst [smem:[#allocation71_spill]] %s2385_s19  ;;  %s111_s9 = scalar_lea.vmem [#allocation6], %s731_s21 }
  0x33   : > { %s118_s12 = sshll.u32 %s111_s9, 4  ;;  %p1765_p7 = pnand %p928_p4, %p1719_p6  ;;  %s1761_s12 = int_to_ptr.vmem [resolvable:$true] %s118_s12 }
  0x34   : > { %s108_s15 = scalar_lea.sflag [#allocation7], %s107_s20 }
  0x35   : > { %p1040_p12 = pneg %p1765_p7 }
  0x37   : > { %s1759_s14 = scalar_lea.hbm %s2387_s2, %s732_s25  ;;  %s1043_s10 = scalar_lea.hbm %s2387_s2, 256 }
  0x38   : > { %s1038_s25 = scalar_lea.hbm %s1759_s14, 128  ;;  %p1044_p6 = scmp.lt.u32.totalorder %s1759_s14, %s2387_s2 }
  0x39   : > { %p1039_p11 = scmp.ne.s32.totalorder %s1759_s14, %s1038_s25  ;;  %p1045_p2 = scmp.lt.u32.totalorder %s1043_s10, %s1038_s25 }
  0x3a   : > { %p1047_p4 = scmp.lt.u32.totalorder %s1038_s25, %s1759_s14 }
  0x3b   : > { %p1041_p13 = pnand %p1040_p12, %p1039_p11  ;;  %p1046_p3 = por %p1045_p2, %p1044_p6 }
  0x3d   : > { %p1042_p0 = pneg %p1041_p13  ;;  %p1048_p8 = por %p1047_p4, %p1046_p3 }
  0x3f   : > { %p1049_p9 = pnand %p1048_p8, %p1042_p0 }
  0x41   : > { %1052 = shalt.err (!%p1049_p9)
}
  0x42   : > { %s1053_s20 = scalar_lea.vmem %s1761_s12, 128  ;;  %s1613_s21 = smov [#allocation6]  }
  0x43   : > { %p1054_p11 = scmp.ne.s32.totalorder %s1761_s12, %s1053_s20  ;;  %s1058_s5 = sshll.u32 %s1613_s21, 4  ;;  %s1059_s5 = int_to_ptr.vmem [resolvable:$false] %s1058_s5 }
  0x44   : > { %s1060_s11 = scalar_lea.vmem %s1059_s5, 256  ;;  %p1061_p1 = scmp.lt.s32.totalorder %s1761_s12, %s1059_s5 }
  0x45   : > { %p1056_p13 = pnand %p1054_p11, %p1040_p12  ;;  %p1062_p6 = scmp.lt.s32.totalorder %s1060_s11, %s1053_s20 }
  0x47   : > { %p1057_p5 = pneg %p1056_p13  ;;  %p1063_p2 = por %p1062_p6, %p1061_p1 }
  0x49   : > { %p1064_p3 = pnand %p1063_p2, %p1057_p5 }
  0x4b   : > { %1067 = shalt.err (!%p1064_p3)
}
  0x4c   : > { %923 = dma.hbm_to_vmem [thread:$0]  (!%p1765_p7), %s1759_s14, 128, %s1761_s12, %s108_s15  }
  0x4d   : > { %p2389_p8 = scmp.lt.s32.totalorder %s1610_s4, 5  ;;  %p2390_p9 = scmp.ge.s32.totalorder %s1610_s4, 1 }
  0x4f   : > { %p124_p12 = pnand %p2390_p9, %p2389_p8 }
  0x51   : > { %127 = sbr.rel (%p124_p12) target bundleno = 592 (0x250), region = 24 }
  0x58   : > { %s129_s25 = sand.u32 1, %s1586_s26  }
  0x59   : > { %s1801_s10 = sshll.u32 %s129_s25, 3  ;;  %s130_s9 = scalar_lea.sflag [#allocation7], %s129_s25 }
  0x5a   : > { %2391 = sst [smem:[#allocation72_spill]] %s1801_s10 }
  0x5b   : > { %1559 = dma.done.wait (%p1729_p10), %s130_s9, 128  }
  0x5c   : > { %1561 = vsyncadd (%p1729_p10), %s130_s9, 4294967168  ;;  %s2344_s14 = sand.u32 1, %s1574_s23   ;;  %s1810_s12 = sshll.u32 %s1598_s28, 3 }
  0x5d   : > { %s1814_s6 = sshll.u32 %s2344_s14, 3  ;;  %s1817_s13 = sand.u32 1, %s1594_s0 }
  0x5e   : > { %2392 = sst [smem:[#allocation73_spill]] %s1814_s6  ;;  %p929_p10 = scmp.eq.s32.totalorder %s1594_s0, 0 }
  0x5f   : > { %s1614_s15 = smov [#allocation2]   ;;  %s1828_s25 = sadd.s32 1, %s1810_s12 }
  0x60   : > { %s172_s21 = sshll.u32 %s1614_s15, 4  ;;  %s1615_s2 = smov [#allocation2 + $0x1]   ;;  %s1825_s21 = int_to_ptr.vmem [resolvable:$true] %s172_s21 }
  0x61   : > { %s894_s5 = scalar_select %p929_p10, [#allocation5], [#allocation44] }
  0x62   : > { %s895_s11 = scalar_select %p929_p10, %s1810_s12, 0 }
  0x63   : > { %s897_s14 = scalar_select %p929_p10, [#allocation5], [#allocation45] }
  0x64   : > { %s158_s9 = sld [smem:[%s894_s5 + %s895_s11]]  ;;  %s192_s8 = sshll.u32 %s1615_s2, 4  ;;  %s1848_s8 = int_to_ptr.vmem [resolvable:$true] %s192_s8 }
  0x65   : > { %s898_s20 = scalar_select %p929_p10, %s1828_s25, 0 }
  0x66   : > { %s1836_s7 = sadd.s32 2, %s1810_s12  ;;  %s1616_s29 = smov [#allocation2 + $0x2]  }
  0x67   : > { %s1838_s15 = sld [smem:[%s897_s14 + %s898_s20]]  ;;  %s212_s17 = sshll.u32 %s1616_s29, 4  ;;  %s1854_s17 = int_to_ptr.vmem [resolvable:$true] %s212_s17 }
  0x68   : > { %s900_s30 = scalar_select %p929_p10, [#allocation5], [#allocation46] }
  0x69   : > { %s901_s5 = scalar_select %p929_p10, %s1836_s7, 0 }
  0x6a   : > { %p159_p1 = scmp.gt.s32.totalorder %s158_s9, 0  ;;  %p738_p5 = scmp.lt.s32.totalorder %s158_s9, 999 }
  0x6b   : > { %s1845_s11 = sld [smem:[%s900_s30 + %s901_s5]]  ;;  %s1861_s29 = scalar_lea.hbm %s2340_s1, 16000 }
  0x6c   : > { %s2432_s9 = smov (!%p159_p1, %s158_s9), 0 }
  0x6d   : > { %s2434_s9 = smov (!%p738_p5, %s2432_s9), 999  ;;  %p178_p7 = scmp.gt.s32.totalorder %s1838_s15, 0 }
  0x6e   : > { %s743_s2 = sshll.u32 %s2434_s9, 4  ;;  %p744_p0 = scmp.lt.s32.totalorder %s1838_s15, 999 }
  0x6f   : > { %s164_s27 = scalar_lea.hbm %s2340_s1, %s743_s2 }
  0x70   : > { %s1068_s26 = scalar_lea.hbm %s164_s27, 16  ;;  %p1073_p6 = scmp.lt.u32.totalorder %s164_s27, %s2340_s1 }
  0x71   : > { %p1069_p4 = scmp.ne.s32.totalorder %s164_s27, %s1068_s26  ;;  %p1074_p2 = scmp.lt.u32.totalorder %s1861_s29, %s1068_s26 }
  0x72   : > { %p1076_p8 = scmp.lt.u32.totalorder %s1068_s26, %s164_s27 }
  0x73   : > { %p1070_p11 = pnand %p1069_p4, %p929_p10  ;;  %p1075_p3 = por %p1074_p2, %p1073_p6 }
  0x75   : > { %p1071_p13 = pneg %p1070_p11  ;;  %p1077_p9 = por %p1076_p8, %p1075_p3 }
  0x77   : > { %p1078_p12 = pnand %p1077_p9, %p1071_p13 }
  0x79   : > { %1081 = shalt.err (!%p1078_p12)  }
  0x7a   : > { %s1082_s9 = scalar_lea.vmem %s1825_s21, 16  ;;  %s1872_s2 = scalar_lea.vmem %s1825_s21, 256 }
  0x7b   : > { %p1083_p1 = scmp.ne.s32.totalorder %s1825_s21, %s1082_s9  ;;  %p1089_p11 = scmp.lt.s32.totalorder %s1825_s21, %s1825_s21 }
  0x7c   : > { %p1090_p6 = scmp.lt.s32.totalorder %s1872_s2, %s1082_s9 }
  0x7d   : > { %p1084_p5 = pnand %p1083_p1, %p929_p10 }
  0x7e   : > { %p1091_p2 = por %p1090_p6, %p1089_p11 }
  0x7f   : > { %p1085_p4 = pneg %p1084_p5 }
  0x81   : > { %p1092_p3 = pnand %p1091_p2, %p1085_p4 }
  0x83   : > { %1095 = shalt.err (!%p1092_p3)  }
  0x84   : > { %896 = dma.hbm_to_vmem [thread:$0]  (%p929_p10), %s164_s27, 16, %s1825_s21, [#allocation3] }
  0x85   : > { %s179_s24 = scalar_select %p178_p7, %s1838_s15, 0 }
  0x86   : > { %p198_p13 = scmp.gt.s32.totalorder %s1845_s11, 0  ;;  %s1889_s20 = sadd.s32 3, %s1810_s12 }
  0x87   : > { %s2436_s24 = smov (!%p744_p0, %s179_s24), 999 }
  0x88   : > { %s199_s26 = scalar_select %p198_p13, %s1845_s11, 0 }
  0x89   : > { %s749_s18 = sshll.u32 %s2436_s24, 4 }
  0x8a   : > { %s183_s5 = scalar_lea.hbm %s2340_s1, %s749_s18 }
  0x8b   : > { %s1096_s9 = scalar_lea.hbm %s183_s5, 16  ;;  %p1101_p7 = scmp.lt.u32.totalorder %s183_s5, %s2340_s1 }
  0x8c   : > { %p1097_p9 = scmp.ne.s32.totalorder %s183_s5, %s1096_s9  ;;  %p1102_p5 = scmp.lt.u32.totalorder %s1861_s29, %s1096_s9 }
  0x8d   : > { %p1104_p0 = scmp.lt.u32.totalorder %s1096_s9, %s183_s5 }
  0x8e   : > { %p1098_p12 = pnand %p1097_p9, %p929_p10  ;;  %p1103_p4 = por %p1102_p5, %p1101_p7 }
  0x90   : > { %p1099_p1 = pneg %p1098_p12  ;;  %p1105_p11 = por %p1104_p0, %p1103_p4 }
  0x92   : > { %p1106_p6 = pnand %p1105_p11, %p1099_p1 }
  0x94   : > { %1109 = shalt.err (!%p1106_p6)  }
  0x95   : > { %s1110_s15 = scalar_lea.vmem %s1848_s8, 16  ;;  %p1117_p9 = scmp.lt.s32.totalorder %s1848_s8, %s1825_s21 }
  0x96   : > { %p1111_p2 = scmp.ne.s32.totalorder %s1848_s8, %s1110_s15  ;;  %p1118_p12 = scmp.lt.s32.totalorder %s1872_s2, %s1110_s15 }
  0x98   : > { %p1112_p3 = pnand %p1111_p2, %p929_p10  ;;  %p1119_p8 = por %p1118_p12, %p1117_p9 }
  0x9a   : > { %p1113_p13 = pneg %p1112_p3 }
  0x9c   : > { %p1120_p5 = pnand %p1119_p8, %p1113_p13 }
  0x9e   : > { %1123 = shalt.err (!%p1120_p5)  }
  0x9f   : > { %899 = dma.hbm_to_vmem [thread:$0]  (%p929_p10), %s183_s5, 16, %s1848_s8, [#allocation3] }
  0xa0   : > { %p2393_p1 = scmp.lt.s32.totalorder %s1845_s11, 999  ;;  %s1617_s18 = smov [#allocation2 + $0x3]  }
  0xa1   : > { %s1914_s19 = scalar_select %p929_p10, [#allocation5], [#allocation47] }
  0xa2   : > { %s2438_s26 = smov (!%p2393_p1, %s199_s26), 999  ;;  %s232_s14 = sshll.u32 %s1617_s18, 4  ;;  %s1947_s14 = int_to_ptr.vmem [resolvable:$true] %s232_s14 }
  0xa3   : > { %s755_s24 = sshll.u32 %s2438_s26, 4  ;;  %s1920_s15 = sadd.s32 4, %s1810_s12 }
  0xa4   : > { %s203_s27 = scalar_lea.hbm %s2340_s1, %s755_s24 }
  0xa5   : > { %s1124_s22 = scalar_lea.hbm %s203_s27, 16  ;;  %p1129_p0 = scmp.lt.u32.totalorder %s203_s27, %s2340_s1 }
  0xa6   : > { %p1125_p8 = scmp.ne.s32.totalorder %s203_s27, %s1124_s22  ;;  %p1130_p11 = scmp.lt.u32.totalorder %s1861_s29, %s1124_s22 }
  0xa7   : > { %p1132_p2 = scmp.lt.u32.totalorder %s1124_s22, %s203_s27 }
  0xa8   : > { %p1126_p7 = pnand %p1125_p8, %p929_p10  ;;  %p1131_p6 = por %p1130_p11, %p1129_p0 }
  0xaa   : > { %p1127_p4 = pneg %p1126_p7  ;;  %p1133_p3 = por %p1132_p2, %p1131_p6 }
  0xac   : > { %p1134_p13 = pnand %p1133_p3, %p1127_p4 }
  0xae   : > { %1137 = shalt.err (!%p1134_p13)  }
  0xaf   : > { %s1138_s26 = scalar_lea.vmem %s1854_s17, 16  ;;  %p1145_p1 = scmp.lt.s32.totalorder %s1854_s17, %s1825_s21 }
  0xb0   : > { %p1139_p9 = scmp.ne.s32.totalorder %s1854_s17, %s1138_s26  ;;  %p1146_p8 = scmp.lt.s32.totalorder %s1872_s2, %s1138_s26 }
  0xb2   : > { %p1140_p12 = pnand %p1139_p9, %p929_p10  ;;  %p1147_p7 = por %p1146_p8, %p1145_p1 }
  0xb4   : > { %p1141_p5 = pneg %p1140_p12 }
  0xb6   : > { %p1148_p0 = pnand %p1147_p7, %p1141_p5 }
  0xb8   : > { %1151 = shalt.err (!%p1148_p0)  }
  0xb9   : > { %902 = dma.hbm_to_vmem [thread:$0]  (%p929_p10), %s203_s27, 16, %s1854_s17, [#allocation3] }
  0xba   : > { %s904_s22 = scalar_select %p929_p10, %s1889_s20, 0 }
  0xbb   : > { %s906_s5 = scalar_select %p929_p10, [#allocation5], [#allocation48] }
  0xbc   : > { %s217_s24 = sld [smem:[%s1914_s19 + %s904_s22]]  ;;  %s1950_s30 = sadd.s32 5, %s1810_s12 }
  0xbd   : > { %s907_s18 = scalar_select %p929_p10, %s1920_s15, 0 }
  0xbe   : > { %s1618_s8 = smov [#allocation2 + $0x4]  }
  0xbf   : > { %s1952_s9 = sld [smem:[%s906_s5 + %s907_s18]]  ;;  %s252_s11 = sshll.u32 %s1618_s8, 4  ;;  %s1959_s11 = int_to_ptr.vmem [resolvable:$true] %s252_s11 }
  0xc0   : > { %s909_s17 = scalar_select %p929_p10, [#allocation5], [#allocation49] }
  0xc1   : > { %s910_s27 = scalar_select %p929_p10, %s1950_s30, 0 }
  0xc2   : > { %p218_p4 = scmp.gt.s32.totalorder %s217_s24, 0  ;;  %p756_p11 = scmp.lt.s32.totalorder %s217_s24, 999 }
  0xc3   : > { %s1961_s19 = sld [smem:[%s909_s17 + %s910_s27]] }
  0xc4   : > { %s2440_s24 = smov (!%p218_p4, %s217_s24), 0 }
  0xc5   : > { %p238_p6 = scmp.gt.s32.totalorder %s1952_s9, 0  ;;  %s2442_s24 = smov (!%p756_p11, %s2440_s24), 999 }
  0xc6   : > { %s761_s22 = sshll.u32 %s2442_s24, 4 }
  0xc7   : > { %s239_s26 = scalar_select %p238_p6, %s1952_s9, 0 }
  0xc8   : > { %s223_s8 = scalar_lea.hbm %s2340_s1, %s761_s22 }
  0xc9   : > { %s1152_s4 = scalar_lea.hbm %s223_s8, 16  ;;  %p1157_p5 = scmp.lt.u32.totalorder %s223_s8, %s2340_s1 }
  0xca   : > { %p1153_p13 = scmp.ne.s32.totalorder %s223_s8, %s1152_s4  ;;  %p1158_p1 = scmp.lt.u32.totalorder %s1861_s29, %s1152_s4 }
  0xcb   : > { %p1160_p7 = scmp.lt.u32.totalorder %s1152_s4, %s223_s8 }
  0xcc   : > { %p1154_p9 = pnand %p1153_p13, %p929_p10  ;;  %p1159_p8 = por %p1158_p1, %p1157_p5 }
  0xce   : > { %p1155_p12 = pneg %p1154_p9  ;;  %p1161_p0 = por %p1160_p7, %p1159_p8 }
  0xd0   : > { %p1162_p4 = pnand %p1161_p0, %p1155_p12 }
  0xd2   : > { %1165 = shalt.err (!%p1162_p4)  }
  0xd3   : > { %s1166_s24 = scalar_lea.vmem %s1947_s14, 16  ;;  %p1173_p9 = scmp.lt.s32.totalorder %s1947_s14, %s1825_s21 }
  0xd4   : > { %p1167_p11 = scmp.ne.s32.totalorder %s1947_s14, %s1166_s24  ;;  %p1174_p3 = scmp.lt.s32.totalorder %s1872_s2, %s1166_s24 }
  0xd6   : > { %p1168_p6 = pnand %p1167_p11, %p929_p10  ;;  %p1175_p2 = por %p1174_p3, %p1173_p9 }
  0xd8   : > { %p1169_p13 = pneg %p1168_p6 }
  0xda   : > { %p1176_p1 = pnand %p1175_p2, %p1169_p13 }
  0xdc   : > { %1179 = shalt.err (!%p1176_p1)  }
  0xdd   : > { %905 = dma.hbm_to_vmem [thread:$0]  (%p929_p10), %s223_s8, 16, %s1947_s14, [#allocation3] }
  0xde   : > { %p2394_p12 = scmp.lt.s32.totalorder %s1952_s9, 999  ;;  %p2395_p5 = scmp.gt.s32.totalorder %s1961_s19, 0 }
  0xdf   : > { %s1619_s18 = smov [#allocation2 + $0x5]  }
  0xe0   : > { %s2444_s26 = smov (!%p2394_p12, %s239_s26), 999  ;;  %s272_s17 = sshll.u32 %s1619_s18, 4  ;;  %s273_s17 = int_to_ptr.vmem [resolvable:$true] %s272_s17 }
  0xe1   : > { %s259_s3 = scalar_select %p2395_p5, %s1961_s19, 0 }
  0xe2   : > { %s767_s4 = sshll.u32 %s2444_s26, 4 }
  0xe3   : > { %s243_s5 = scalar_lea.hbm %s2340_s1, %s767_s4 }
  0xe4   : > { %s1180_s24 = scalar_lea.hbm %s243_s5, 16  ;;  %p1185_p0 = scmp.lt.u32.totalorder %s243_s5, %s2340_s1 }
  0xe5   : > { %p1181_p2 = scmp.ne.s32.totalorder %s243_s5, %s1180_s24  ;;  %p1186_p4 = scmp.lt.u32.totalorder %s1861_s29, %s1180_s24 }
  0xe6   : > { %p1188_p6 = scmp.lt.u32.totalorder %s1180_s24, %s243_s5 }
  0xe7   : > { %p1182_p3 = pnand %p1181_p2, %p929_p10  ;;  %p1187_p11 = por %p1186_p4, %p1185_p0 }
  0xe9   : > { %p1183_p7 = pneg %p1182_p3  ;;  %p1189_p13 = por %p1188_p6, %p1187_p11 }
  0xeb   : > { %p1190_p9 = pnand %p1189_p13, %p1183_p7 }
  0xed   : > { %1193 = shalt.err (!%p1190_p9)  }
  0xee   : > { %s1194_s14 = scalar_lea.vmem %s1959_s11, 16  ;;  %p1201_p2 = scmp.lt.s32.totalorder %s1959_s11, %s1825_s21 }
  0xef   : > { %p1195_p1 = scmp.ne.s32.totalorder %s1959_s11, %s1194_s14  ;;  %p1202_p3 = scmp.lt.s32.totalorder %s1872_s2, %s1194_s14 }
  0xf1   : > { %p1196_p12 = pnand %p1195_p1, %p929_p10  ;;  %p1203_p8 = por %p1202_p3, %p1201_p2 }
  0xf3   : > { %p1197_p5 = pneg %p1196_p12 }
  0xf5   : > { %p1204_p0 = pnand %p1203_p8, %p1197_p5 }
  0xf7   : > { %1207 = shalt.err (!%p1204_p0)  }
  0xf8   : > { %908 = dma.hbm_to_vmem [thread:$0]  (%p929_p10), %s243_s5, 16, %s1959_s11, [#allocation3] }
  0xf9   : > { %p2396_p7 = scmp.lt.s32.totalorder %s1961_s19, 999  ;;  %s2017_s8 = sadd.s32 6, %s1810_s12 }
  0xfb   : > { %s2446_s3 = smov (!%p2396_p7, %s259_s3), 999 }
  0xfc   : > { %s773_s23 = sshll.u32 %s2446_s3, 4 }
  0xfd   : > { %s263_s26 = scalar_lea.hbm %s2340_s1, %s773_s23 }
  0xfe   : > { %s1208_s4 = scalar_lea.hbm %s263_s26, 16  ;;  %p1213_p6 = scmp.lt.u32.totalorder %s263_s26, %s2340_s1 }
  0xff   : > { %p1209_p8 = scmp.ne.s32.totalorder %s263_s26, %s1208_s4  ;;  %p1214_p13 = scmp.lt.u32.totalorder %s1861_s29, %s1208_s4 }
 0x100   : > { %p1216_p1 = scmp.lt.u32.totalorder %s1208_s4, %s263_s26 }
 0x101   : > { %p1210_p4 = pnand %p1209_p8, %p929_p10  ;;  %p1215_p9 = por %p1214_p13, %p1213_p6 }
 0x103   : > { %p1211_p11 = pneg %p1210_p4  ;;  %p1217_p12 = por %p1216_p1, %p1215_p9 }
 0x105   : > { %p1218_p5 = pnand %p1217_p12, %p1211_p11 }
 0x107   : > { %1221 = shalt.err (!%p1218_p5)  }
 0x108   : > { %s1222_s11 = scalar_lea.vmem %s273_s17, 16  ;;  %p1229_p7 = scmp.lt.s32.totalorder %s273_s17, %s1825_s21 }
 0x109   : > { %p1223_p2 = scmp.ne.s32.totalorder %s273_s17, %s1222_s11  ;;  %p1230_p8 = scmp.lt.s32.totalorder %s1872_s2, %s1222_s11 }
 0x10b   : > { %p1224_p3 = pnand %p1223_p2, %p929_p10  ;;  %p1231_p4 = por %p1230_p8, %p1229_p7 }
 0x10d   : > { %p1225_p0 = pneg %p1224_p3 }
 0x10f   : > { %p1232_p6 = pnand %p1231_p4, %p1225_p0 }
 0x111   : > { %1235 = shalt.err (!%p1232_p6)  }
 0x112   : > { %911 = dma.hbm_to_vmem [thread:$0]  (%p929_p10), %s263_s26, 16, %s273_s17, [#allocation3] }
 0x113   : > { %s912_s19 = scalar_select %p929_p10, [#allocation5], [#allocation50] }
 0x114   : > { %s913_s3 = scalar_select %p929_p10, %s2017_s8, 0 }
 0x115   : > { %s2037_s5 = sadd.s32 7, %s1810_s12  ;;  %s2045_s23 = sadd.s32 1, %s1594_s0 }
 0x116   : > { %s277_s18 = sld [smem:[%s912_s19 + %s913_s3]]  ;;  %s1620_s17 = smov [#allocation2 + $0x6]  }
 0x117   : > { %s915_s24 = scalar_select %p929_p10, [#allocation5], [#allocation51] }
 0x118   : > { %s916_s14 = scalar_select %p929_p10, %s2037_s5, 0 }
 0x119   : > { %s292_s9 = sshll.u32 %s1620_s17, 4  ;;  %s1621_s4 = smov [#allocation2 + $0x7]   ;;  %s293_s9 = int_to_ptr.vmem [resolvable:$true] %s292_s9 }
 0x11a   : > { %s2047_s16 = sld [smem:[%s915_s24 + %s916_s14]]  ;;  %s312_s27 = sshll.u32 %s1621_s4, 4  ;;  %s313_s27 = int_to_ptr.vmem [resolvable:$true] %s312_s27 }
 0x11c   : > { %p278_p11 = scmp.gt.s32.totalorder %s277_s18, 0  ;;  %p774_p13 = scmp.lt.s32.totalorder %s277_s18, 999 }
 0x11e   : > { %s2448_s18 = smov (!%p278_p11, %s277_s18), 0 }
 0x11f   : > { %s2450_s18 = smov (!%p774_p13, %s2448_s18), 999 }
 0x120   : > { %s779_s26 = sshll.u32 %s2450_s18, 4 }
 0x121   : > { %s283_s19 = scalar_lea.hbm %s2340_s1, %s779_s26 }
 0x122   : > { %s1236_s3 = scalar_lea.hbm %s283_s19, 16  ;;  %p1241_p3 = scmp.lt.u32.totalorder %s283_s19, %s2340_s1 }
 0x123   : > { %p1237_p12 = scmp.ne.s32.totalorder %s283_s19, %s1236_s3  ;;  %p1242_p0 = scmp.lt.u32.totalorder %s1861_s29, %s1236_s3 }
 0x124   : > { %p1244_p8 = scmp.lt.u32.totalorder %s1236_s3, %s283_s19 }
 0x125   : > { %p1238_p5 = pnand %p1237_p12, %p929_p10  ;;  %p1243_p7 = por %p1242_p0, %p1241_p3 }
 0x127   : > { %p1239_p2 = pneg %p1238_p5  ;;  %p1245_p4 = por %p1244_p8, %p1243_p7 }
 0x129   : > { %p1246_p6 = pnand %p1245_p4, %p1239_p2 }
 0x12b   : > { %1249 = shalt.err (!%p1246_p6)  }
 0x12c   : > { %s1250_s18 = scalar_lea.vmem %s293_s9, 16  ;;  %p1257_p12 = scmp.lt.s32.totalorder %s293_s9, %s1825_s21 }
 0x12d   : > { %p1251_p11 = scmp.ne.s32.totalorder %s293_s9, %s1250_s18  ;;  %p1258_p5 = scmp.lt.s32.totalorder %s1872_s2, %s1250_s18 }
 0x12f   : > { %p1252_p13 = pnand %p1251_p11, %p929_p10  ;;  %p1259_p9 = por %p1258_p5, %p1257_p12 }
 0x131   : > { %p1253_p1 = pneg %p1252_p13 }
 0x133   : > { %p1260_p0 = pnand %p1259_p9, %p1253_p1 }
 0x135   : > { %1263 = shalt.err (!%p1260_p0)  }
 0x136   : > { %914 = dma.hbm_to_vmem [thread:$0]  (%p929_p10), %s283_s19, 16, %s293_s9, [#allocation3] }
 0x137   : > { %p2397_p2 = scmp.gt.s32.totalorder %s2047_s16, 0  ;;  %p2398_p3 = scmp.lt.s32.totalorder %s2047_s16, 999 }
 0x139   : > { %s299_s17 = scalar_select %p2397_p2, %s2047_s16, 0 }
 0x13b   : > { %s2452_s17 = smov (!%p2398_p3, %s299_s17), 999 }
 0x13c   : > { %s785_s26 = sshll.u32 %s2452_s17, 4 }
 0x13d   : > { %s303_s11 = scalar_lea.hbm %s2340_s1, %s785_s26 }
 0x13e   : > { %s1264_s3 = scalar_lea.hbm %s303_s11, 16  ;;  %p1269_p8 = scmp.lt.u32.totalorder %s303_s11, %s2340_s1 }
 0x13f   : > { %p1265_p9 = scmp.ne.s32.totalorder %s303_s11, %s1264_s3  ;;  %p1270_p4 = scmp.lt.u32.totalorder %s1861_s29, %s1264_s3 }
 0x140   : > { %p1272_p11 = scmp.lt.u32.totalorder %s1264_s3, %s303_s11 }
 0x141   : > { %p1266_p1 = pnand %p1265_p9, %p929_p10  ;;  %p1271_p6 = por %p1270_p4, %p1269_p8 }
 0x143   : > { %p1267_p7 = pneg %p1266_p1  ;;  %p1273_p13 = por %p1272_p11, %p1271_p6 }
 0x145   : > { %p1274_p12 = pnand %p1273_p13, %p1267_p7 }
 0x147   : > { %1277 = shalt.err (!%p1274_p12)  }
 0x148   : > { %s1278_s16 = scalar_lea.vmem %s313_s27, 16  ;;  %p1285_p3 = scmp.lt.s32.totalorder %s313_s27, %s1825_s21 }
 0x149   : > { %p1279_p5 = scmp.ne.s32.totalorder %s313_s27, %s1278_s16  ;;  %p1286_p9 = scmp.lt.s32.totalorder %s1872_s2, %s1278_s16 }
 0x14b   : > { %p1280_p0 = pnand %p1279_p5, %p929_p10  ;;  %p1287_p1 = por %p1286_p9, %p1285_p3 }
 0x14d   : > { %p1281_p2 = pneg %p1280_p0 }
 0x14f   : > { %p1288_p4 = pnand %p1287_p1, %p1281_p2 }
 0x151   : > { %1291 = shalt.err (!%p1288_p4)  }
 0x152   : > { %917 = dma.hbm_to_vmem [thread:$0]  (%p929_p10), %s303_s11, 16, %s313_s27, [#allocation3] }
 0x153   : > { %p786_p7 = scmp.ge.s32.totalorder %s2045_s23, 2 }
 0x154   : > { %s321_s19 = ssub.s32 (!%p786_p7), 1, %s1817_s13  ;;  %s322_s18 = sshra.s32 (!%p786_p7), %s1810_s12, 7 }
 0x155   : > { %320 = sbr.rel (%p786_p7) target bundleno = 556 (0x22c), region = 68  ;;  %s324_s17 = sadd.s32 (!%p786_p7), %s322_s18, %s2045_s23 }
 0x156   : > { %s327_s26 = sand.u32 (!%p786_p7), 127, %s1810_s12  ;;  %s787_s4 = sshll.u32 (!%p786_p7), %s324_s17, 7 }
 0x157   : > { %s794_s22 = sshll.u32 (!%p786_p7), %s321_s19, 3  ;;  %s328_s27 = sadd.s32 (!%p786_p7), %s787_s4, %s327_s26 }
 0x158   : > { %s329_s11 = sld [smem:[#allocation5 + %s328_s27]] (!%p786_p7)  ;;  %s351_s3 = sshra.s32 (!%p786_p7), %s1828_s25, 7 }
 0x159   : > { %s2095_s24 = scalar_lea.vmem (!%p786_p7), [#allocation2], %s794_s22  ;;  %s353_s16 = sadd.s32 (!%p786_p7), %s351_s3, %s2045_s23 }
 0x15a   : > { %s346_s14 = sshll.u32 (!%p786_p7), %s2095_s24, 4  ;;  %s795_s9 = sshll.u32 (!%p786_p7), %s353_s16, 7  ;;  %s2101_s14 = int_to_ptr.vmem [resolvable:$true] %s346_s14 }
 0x15b   : > { %s356_s10 = sand.u32 (!%p786_p7), 127, %s1828_s25  ;;  %s648_s18 = scalar_lea.vmem (!%p786_p7), %s2095_s24, 1 [#allocation2] }
 0x15c   : > { %s357_s6 = sadd.s32 %s795_s9, %s356_s10  ;;  %s2105_s17 = sshll.u32 %s648_s18, 4  ;;  %s375_s17 = int_to_ptr.vmem [resolvable:$true] %s2105_s17 }
 0x15d   : > { %s2103_s12 = sld [smem:[#allocation5 + %s357_s6]]  ;;  %s379_s26 = sshra.s32 %s1836_s7, 7 }
 0x15e   : > { %p330_p10 = scmp.gt.s32.totalorder %s329_s11, 0  ;;  %p788_p8 = scmp.lt.s32.totalorder %s329_s11, 999 }
 0x15f   : > { %s381_s4 = sadd.s32 %s379_s26, %s2045_s23  ;;  %s384_s22 = sand.u32 127, %s1836_s7 }
 0x160   : > { %s2454_s11 = smov (!%p330_p10, %s329_s11), 0  ;;  %s803_s25 = sshll.u32 %s381_s4, 7 }
 0x161   : > { %s2456_s11 = smov (!%p788_p8, %s2454_s11), 999  ;;  %s385_s3 = sadd.s32 %s803_s25, %s384_s22 }
 0x162   : > { %s793_s10 = sshll.u32 %s2456_s11, 4  ;;  %s2117_s16 = scalar_lea.sflag [#allocation3], %s321_s19 }
 0x163   : > { %p359_p6 = scmp.gt.s32.totalorder %s2103_s12, 0  ;;  %p796_p11 = scmp.lt.s32.totalorder %s2103_s12, 999 }
 0x164   : > { %s335_s6 = scalar_lea.hbm %s2340_s1, %s793_s10 }
 0x165   : > { %s1292_s18 = scalar_lea.hbm %s335_s6, 16  ;;  %p1295_p12 = scmp.lt.u32.totalorder %s335_s6, %s2340_s1 }
 0x166   : > { %p1293_p13 = scmp.ne.s32.totalorder %s335_s6, %s1292_s18  ;;  %p1296_p5 = scmp.lt.u32.totalorder %s1861_s29, %s1292_s18 }
 0x167   : > { %p1298_p2 = scmp.lt.u32.totalorder %s1292_s18, %s335_s6 }
 0x168   : > { %p1297_p0 = por %p1296_p5, %p1295_p12 }
 0x16a   : > { %p1299_p3 = por %p1298_p2, %p1297_p0 }
 0x16c   : > { %p1300_p9 = pnand %p1299_p3, %p1293_p13 }
 0x16e   : > { %1303 = shalt.err (!%p1300_p9)  }
 0x16f   : > { %s1304_s7 = scalar_lea.vmem %s2101_s14, 16  ;;  %p1309_p4 = scmp.lt.s32.totalorder %s2101_s14, %s1825_s21 }
 0x170   : > { %p1305_p1 = scmp.ne.s32.totalorder %s2101_s14, %s1304_s7  ;;  %p1310_p7 = scmp.lt.s32.totalorder %s1872_s2, %s1304_s7 }
 0x172   : > { %p1311_p10 = por %p1310_p7, %p1309_p4 }
 0x174   : > { %p1312_p8 = pnand %p1311_p10, %p1305_p1 }
 0x176   : > { %1315 = shalt.err (!%p1312_p8)  }
 0x177   : > { %349 = dma.hbm_to_vmem [thread:$0]  %s335_s6, 16, %s2101_s14, %s2117_s16 }
 0x178   : > { %s360_s0 = scalar_select %p359_p6, %s2103_s12, 0 }
 0x179   : > { %s2133_s28 = sld [smem:[#allocation5 + %s385_s3]]  ;;  %s653_s19 = scalar_lea.vmem %s2095_s24, 2 [#allocation2] }
 0x17a   : > { %s2458_s0 = smov (!%p796_p11, %s360_s0), 999  ;;  %s407_s11 = sshra.s32 %s1889_s20, 7 }
 0x17b   : > { %s801_s26 = sshll.u32 %s2458_s0, 4  ;;  %s402_s4 = sshll.u32 %s653_s19, 4  ;;  %s403_s4 = int_to_ptr.vmem [resolvable:$true] %s402_s4 }
 0x17c   : > { %s364_s25 = scalar_lea.hbm %s2340_s1, %s801_s26  ;;  %s409_s9 = sadd.s32 %s407_s11, %s2045_s23 }
 0x17d   : > { %s1316_s27 = scalar_lea.hbm %s364_s25, 16  ;;  %p1319_p6 = scmp.lt.u32.totalorder %s364_s25, %s2340_s1 }
 0x17e   : > { %p1317_p13 = scmp.ne.s32.totalorder %s364_s25, %s1316_s27  ;;  %p1320_p12 = scmp.lt.u32.totalorder %s1861_s29, %s1316_s27 }
 0x17f   : > { %p1322_p0 = scmp.lt.u32.totalorder %s1316_s27, %s364_s25 }
 0x180   : > { %p1321_p5 = por %p1320_p12, %p1319_p6 }
 0x182   : > { %p1323_p2 = por %p1322_p0, %p1321_p5 }
 0x184   : > { %p1324_p11 = pnand %p1323_p2, %p1317_p13 }
 0x186   : > { %1327 = shalt.err (!%p1324_p11)  }
 0x187   : > { %s1328_s12 = scalar_lea.vmem %s375_s17, 16  ;;  %p1333_p9 = scmp.lt.s32.totalorder %s375_s17, %s1825_s21 }
 0x188   : > { %p1329_p3 = scmp.ne.s32.totalorder %s375_s17, %s1328_s12  ;;  %p1334_p1 = scmp.lt.s32.totalorder %s1872_s2, %s1328_s12 }
 0x18a   : > { %p1335_p4 = por %p1334_p1, %p1333_p9 }
 0x18c   : > { %p1336_p7 = pnand %p1335_p4, %p1329_p3 }
 0x18e   : > { %1339 = shalt.err (!%p1336_p7)  }
 0x18f   : > { %377 = dma.hbm_to_vmem [thread:$0]  %s364_s25, 16, %s375_s17, %s2117_s16 }
 0x190   : > { %p387_p10 = scmp.gt.s32.totalorder %s2133_s28, 0  ;;  %p804_p8 = scmp.lt.s32.totalorder %s2133_s28, 999 }
 0x191   : > { %s811_s6 = sshll.u32 %s409_s9, 7  ;;  %s412_s3 = sand.u32 127, %s1889_s20 }
 0x192   : > { %s2460_s28 = smov (!%p387_p10, %s2133_s28), 0  ;;  %s413_s7 = sadd.s32 %s811_s6, %s412_s3 }
 0x193   : > { %s658_s0 = scalar_lea.vmem %s2095_s24, 3 [#allocation2]  ;;  %s2462_s28 = smov (!%p804_p8, %s2460_s28), 999 }
 0x194   : > { %s2156_s19 = sld [smem:[#allocation5 + %s413_s7]]  ;;  %s809_s11 = sshll.u32 %s2462_s28, 4 }
 0x195   : > { %s430_s26 = sshll.u32 %s658_s0, 4  ;;  %s392_s27 = scalar_lea.hbm %s2340_s1, %s809_s11  ;;  %s2174_s26 = int_to_ptr.vmem [resolvable:$true] %s430_s26 }
 0x196   : > { %s435_s18 = sshra.s32 %s1920_s15, 7  ;;  %s1340_s17 = scalar_lea.hbm %s392_s27, 16 }
 0x197   : > { %p1341_p13 = scmp.ne.s32.totalorder %s392_s27, %s1340_s17  ;;  %p1343_p6 = scmp.lt.u32.totalorder %s392_s27, %s2340_s1 }
 0x198   : > { %p1344_p12 = scmp.lt.u32.totalorder %s1861_s29, %s1340_s17  ;;  %p1346_p0 = scmp.lt.u32.totalorder %s1340_s17, %s392_s27 }
 0x19a   : > { %p1345_p5 = por %p1344_p12, %p1343_p6 }
 0x19c   : > { %p1347_p2 = por %p1346_p0, %p1345_p5 }
 0x19e   : > { %p1348_p11 = pnand %p1347_p2, %p1341_p13 }
 0x1a0   : > { %1351 = shalt.err (!%p1348_p11)  }
 0x1a1   : > { %s1352_s20 = scalar_lea.vmem %s403_s4, 16  ;;  %p1357_p9 = scmp.lt.s32.totalorder %s403_s4, %s1825_s21 }
 0x1a2   : > { %p1353_p3 = scmp.ne.s32.totalorder %s403_s4, %s1352_s20  ;;  %p1358_p1 = scmp.lt.s32.totalorder %s1872_s2, %s1352_s20 }
 0x1a4   : > { %p1359_p4 = por %p1358_p1, %p1357_p9 }
 0x1a6   : > { %p1360_p7 = pnand %p1359_p4, %p1353_p3 }
 0x1a8   : > { %1363 = shalt.err (!%p1360_p7)  }
 0x1a9   : > { %405 = dma.hbm_to_vmem [thread:$0]  %s392_s27, 16, %s403_s4, %s2117_s16 }
 0x1aa   : > { %s437_s28 = sadd.s32 %s435_s18, %s2045_s23  ;;  %s440_s9 = sand.u32 127, %s1920_s15 }
 0x1ab   : > { %s819_s12 = sshll.u32 %s437_s28, 7  ;;  %s663_s6 = scalar_lea.vmem %s2095_s24, 4 [#allocation2] }
 0x1ac   : > { %p415_p10 = scmp.gt.s32.totalorder %s2156_s19, 0  ;;  %p812_p8 = scmp.lt.s32.totalorder %s2156_s19, 999 }
 0x1ad   : > { %s441_s3 = sadd.s32 %s819_s12, %s440_s9  ;;  %s2179_s0 = sshll.u32 %s663_s6, 4  ;;  %s459_s0 = int_to_ptr.vmem [resolvable:$true] %s2179_s0 }
 0x1ae   : > { %s2464_s19 = smov (!%p415_p10, %s2156_s19), 0  ;;  %s2177_s7 = sld [smem:[#allocation5 + %s441_s3]] }
 0x1af   : > { %s2466_s19 = smov (!%p812_p8, %s2464_s19), 999  ;;  %s463_s11 = sshra.s32 %s1950_s30, 7 }
 0x1b0   : > { %s468_s22 = sand.u32 127, %s1950_s30  ;;  %s817_s4 = sshll.u32 %s2466_s19, 4 }
 0x1b1   : > { %s465_s10 = sadd.s32 %s463_s11, %s2045_s23  ;;  %s420_s18 = scalar_lea.hbm %s2340_s1, %s817_s4 }
 0x1b2   : > { %s827_s17 = sshll.u32 %s465_s10, 7  ;;  %s1364_s25 = scalar_lea.hbm %s420_s18, 16 }
 0x1b3   : > { %p1365_p13 = scmp.ne.s32.totalorder %s420_s18, %s1364_s25  ;;  %p1367_p6 = scmp.lt.u32.totalorder %s420_s18, %s2340_s1 }
 0x1b4   : > { %p1368_p12 = scmp.lt.u32.totalorder %s1861_s29, %s1364_s25  ;;  %p1370_p0 = scmp.lt.u32.totalorder %s1364_s25, %s420_s18 }
 0x1b6   : > { %p1369_p5 = por %p1368_p12, %p1367_p6 }
 0x1b8   : > { %p1371_p2 = por %p1370_p0, %p1369_p5 }
 0x1ba   : > { %p1372_p11 = pnand %p1371_p2, %p1365_p13 }
 0x1bc   : > { %1375 = shalt.err (!%p1372_p11)  }
 0x1bd   : > { %s1376_s30 = scalar_lea.vmem %s2174_s26, 16  ;;  %p1381_p9 = scmp.lt.s32.totalorder %s2174_s26, %s1825_s21 }
 0x1be   : > { %p1377_p3 = scmp.ne.s32.totalorder %s2174_s26, %s1376_s30  ;;  %p1382_p1 = scmp.lt.s32.totalorder %s1872_s2, %s1376_s30 }
 0x1c0   : > { %p1383_p4 = por %p1382_p1, %p1381_p9 }
 0x1c2   : > { %p1384_p7 = pnand %p1383_p4, %p1377_p3 }
 0x1c4   : > { %1387 = shalt.err (!%p1384_p7)  }
 0x1c5   : > { %433 = dma.hbm_to_vmem [thread:$0]  %s420_s18, 16, %s2174_s26, %s2117_s16 }
 0x1c6   : > { %p443_p10 = scmp.gt.s32.totalorder %s2177_s7, 0  ;;  %p820_p8 = scmp.lt.s32.totalorder %s2177_s7, 999 }
 0x1c7   : > { %s469_s19 = sadd.s32 %s827_s17, %s468_s22  ;;  %s668_s28 = scalar_lea.vmem %s2095_s24, 5 [#allocation2] }
 0x1c8   : > { %s2468_s7 = smov (!%p443_p10, %s2177_s7), 0  ;;  %s2203_s9 = sld [smem:[#allocation5 + %s469_s19]] }
 0x1c9   : > { %s2470_s7 = smov (!%p820_p8, %s2468_s7), 999  ;;  %s486_s12 = sshll.u32 %s668_s28, 4  ;;  %s487_s12 = int_to_ptr.vmem [resolvable:$true] %s486_s12 }
 0x1ca   : > { %s491_s6 = sshra.s32 %s2017_s8, 7  ;;  %s825_s3 = sshll.u32 %s2470_s7, 4 }
 0x1cb   : > { %s493_s11 = sadd.s32 %s491_s6, %s2045_s23  ;;  %s448_s27 = scalar_lea.hbm %s2340_s1, %s825_s3 }
 0x1cc   : > { %s835_s15 = sshll.u32 %s493_s11, 7  ;;  %s1388_s26 = scalar_lea.hbm %s448_s27, 16 }
 0x1cd   : > { %p1389_p13 = scmp.ne.s32.totalorder %s448_s27, %s1388_s26  ;;  %p1391_p6 = scmp.lt.u32.totalorder %s448_s27, %s2340_s1 }
 0x1ce   : > { %p1392_p12 = scmp.lt.u32.totalorder %s1861_s29, %s1388_s26  ;;  %p1394_p0 = scmp.lt.u32.totalorder %s1388_s26, %s448_s27 }
 0x1d0   : > { %p1393_p5 = por %p1392_p12, %p1391_p6 }
 0x1d2   : > { %p1395_p2 = por %p1394_p0, %p1393_p5 }
 0x1d4   : > { %p1396_p11 = pnand %p1395_p2, %p1389_p13 }
 0x1d6   : > { %1399 = shalt.err (!%p1396_p11)  }
 0x1d7   : > { %s1400_s22 = scalar_lea.vmem %s459_s0, 16  ;;  %p1405_p9 = scmp.lt.s32.totalorder %s459_s0, %s1825_s21 }
 0x1d8   : > { %p1401_p3 = scmp.ne.s32.totalorder %s459_s0, %s1400_s22  ;;  %p1406_p1 = scmp.lt.s32.totalorder %s1872_s2, %s1400_s22 }
 0x1da   : > { %p1407_p4 = por %p1406_p1, %p1405_p9 }
 0x1dc   : > { %p1408_p7 = pnand %p1407_p4, %p1401_p3 }
 0x1de   : > { %1411 = shalt.err (!%p1408_p7)  }
 0x1df   : > { %461 = dma.hbm_to_vmem [thread:$0]  %s448_s27, 16, %s459_s0, %s2117_s16 }
 0x1e0   : > { %p471_p10 = scmp.gt.s32.totalorder %s2203_s9, 0  ;;  %p828_p8 = scmp.lt.s32.totalorder %s2203_s9, 999 }
 0x1e1   : > { %s496_s7 = sand.u32 127, %s2017_s8  ;;  %s673_s20 = scalar_lea.vmem %s2095_s24, 6 [#allocation2] }
 0x1e2   : > { %s2472_s9 = smov (!%p471_p10, %s2203_s9), 0  ;;  %s497_s17 = sadd.s32 %s835_s15, %s496_s7 }
 0x1e3   : > { %s2474_s9 = smov (!%p828_p8, %s2472_s9), 999  ;;  %s2221_s14 = sld [smem:[#allocation5 + %s497_s17]] }
 0x1e4   : > { %s833_s30 = sshll.u32 %s2474_s9, 4  ;;  %s519_s19 = sshra.s32 %s2037_s5, 7 }
 0x1e5   : > { %s476_s3 = scalar_lea.hbm %s2340_s1, %s833_s30  ;;  %s521_s11 = sadd.s32 %s519_s19, %s2045_s23 }
 0x1e6   : > { %s1412_s4 = scalar_lea.hbm %s476_s3, 16  ;;  %p1415_p6 = scmp.lt.u32.totalorder %s476_s3, %s2340_s1 }
 0x1e7   : > { %p1413_p13 = scmp.ne.s32.totalorder %s476_s3, %s1412_s4  ;;  %p1416_p12 = scmp.lt.u32.totalorder %s1861_s29, %s1412_s4 }
 0x1e8   : > { %p1418_p0 = scmp.lt.u32.totalorder %s1412_s4, %s476_s3 }
 0x1e9   : > { %p1417_p5 = por %p1416_p12, %p1415_p6 }
 0x1eb   : > { %p1419_p2 = por %p1418_p0, %p1417_p5 }
 0x1ed   : > { %p1420_p11 = pnand %p1419_p2, %p1413_p13 }
 0x1ef   : > { %1423 = shalt.err (!%p1420_p11)  }
 0x1f0   : > { %s1424_s8 = scalar_lea.vmem %s487_s12, 16  ;;  %p1429_p9 = scmp.lt.s32.totalorder %s487_s12, %s1825_s21 }
 0x1f1   : > { %p1425_p3 = scmp.ne.s32.totalorder %s487_s12, %s1424_s8  ;;  %p1430_p1 = scmp.lt.s32.totalorder %s1872_s2, %s1424_s8 }
 0x1f3   : > { %p1431_p4 = por %p1430_p1, %p1429_p9 }
 0x1f5   : > { %p1432_p7 = pnand %p1431_p4, %p1425_p3 }
 0x1f7   : > { %1435 = shalt.err (!%p1432_p7)  }
 0x1f8   : > { %489 = dma.hbm_to_vmem [thread:$0]  %s476_s3, 16, %s487_s12, %s2117_s16 }
 0x1f9   : > { %s843_s23 = sshll.u32 %s521_s11, 7  ;;  %s524_s9 = sand.u32 127, %s2037_s5 }
 0x1fa   : > { %s525_s27 = sadd.s32 %s843_s23, %s524_s9  ;;  %p499_p10 = scmp.gt.s32.totalorder %s2221_s14, 0 }
 0x1fb   : > { %p836_p8 = scmp.lt.s32.totalorder %s2221_s14, 999  ;;  %s514_s15 = sshll.u32 %s673_s20, 4  ;;  %s515_s15 = int_to_ptr.vmem [resolvable:$true] %s514_s15 }
 0x1fc   : > { %s526_s26 = sld [smem:[#allocation5 + %s525_s27]]  ;;  %s2476_s14 = smov (!%p499_p10, %s2221_s14), 0 }
 0x1fd   : > { %s2478_s14 = smov (!%p836_p8, %s2476_s14), 999  ;;  %s678_s25 = scalar_lea.vmem %s2095_s24, 7 [#allocation2] }
 0x1fe   : > { %s841_s18 = sshll.u32 %s2478_s14, 4 }
 0x1ff   : > { %s504_s17 = scalar_lea.hbm %s2340_s1, %s841_s18 }
 0x200   : > { %s1436_s30 = scalar_lea.hbm %s504_s17, 16  ;;  %p1439_p12 = scmp.lt.u32.totalorder %s504_s17, %s2340_s1 }
 0x201   : > { %p1437_p6 = scmp.ne.s32.totalorder %s504_s17, %s1436_s30  ;;  %p1440_p5 = scmp.lt.u32.totalorder %s1861_s29, %s1436_s30 }
 0x202   : > { %p527_p13 = scmp.gt.s32.totalorder %s526_s26, 0  ;;  %p1442_p2 = scmp.lt.u32.totalorder %s1436_s30, %s504_s17 }
 0x203   : > { %p1441_p0 = por %p1440_p5, %p1439_p12 }
 0x205   : > { %p1443_p11 = por %p1442_p2, %p1441_p0 }
 0x207   : > { %p1444_p3 = pnand %p1443_p11, %p1437_p6 }
 0x209   : > { %1447 = shalt.err (!%p1444_p3)  }
 0x20a   : > { %s1448_s20 = scalar_lea.vmem %s515_s15, 16  ;;  %p1453_p1 = scmp.lt.s32.totalorder %s515_s15, %s1825_s21 }
 0x20b   : > { %p1449_p9 = scmp.ne.s32.totalorder %s515_s15, %s1448_s20  ;;  %p1454_p4 = scmp.lt.s32.totalorder %s1872_s2, %s1448_s20 }
 0x20d   : > { %p1455_p7 = por %p1454_p4, %p1453_p1 }
 0x20f   : > { %p1456_p10 = pnand %p1455_p7, %p1449_p9 }
 0x211   : > { %1459 = shalt.err (!%p1456_p10)  }
 0x212   : > { %517 = dma.hbm_to_vmem [thread:$0]  %s504_s17, 16, %s515_s15, %s2117_s16 }
 0x213   : > { %s528_s24 = scalar_select %p527_p13, %s526_s26, 0 }
 0x214   : > { %p844_p8 = scmp.lt.s32.totalorder %s526_s26, 999  ;;  %s542_s14 = sshll.u32 %s678_s25, 4  ;;  %s543_s14 = int_to_ptr.vmem [resolvable:$true] %s542_s14 }
 0x216   : > { %s2480_s24 = smov (!%p844_p8, %s528_s24), 999 }
 0x217   : > { %s849_s19 = sshll.u32 %s2480_s24, 4 }
 0x218   : > { %s532_s3 = scalar_lea.hbm %s2340_s1, %s849_s19 }
 0x219   : > { %s1460_s11 = scalar_lea.hbm %s532_s3, 16  ;;  %p1463_p12 = scmp.lt.u32.totalorder %s532_s3, %s2340_s1 }
 0x21a   : > { %p1461_p6 = scmp.ne.s32.totalorder %s532_s3, %s1460_s11  ;;  %p1464_p5 = scmp.lt.u32.totalorder %s1861_s29, %s1460_s11 }
 0x21b   : > { %p1466_p2 = scmp.lt.u32.totalorder %s1460_s11, %s532_s3 }
 0x21c   : > { %p1465_p0 = por %p1464_p5, %p1463_p12 }
 0x21e   : > { %p1467_p11 = por %p1466_p2, %p1465_p0 }
 0x220   : > { %p1468_p13 = pnand %p1467_p11, %p1461_p6 }
 0x222   : > { %1471 = shalt.err (!%p1468_p13)  }
 0x223   : > { %s1472_s10 = scalar_lea.vmem %s543_s14, 16  ;;  %p1477_p9 = scmp.lt.s32.totalorder %s543_s14, %s1825_s21 }
 0x224   : > { %p1473_p3 = scmp.ne.s32.totalorder %s543_s14, %s1472_s10  ;;  %p1478_p1 = scmp.lt.s32.totalorder %s1872_s2, %s1472_s10 }
 0x226   : > { %p1479_p4 = por %p1478_p1, %p1477_p9 }
 0x228   : > { %p1480_p7 = pnand %p1479_p4, %p1473_p3 }
 0x22a   : > { %1483 = shalt.err (!%p1480_p7)  }
 0x22b   : > { %545 = dma.hbm_to_vmem [thread:$0]  %s532_s3, 16, %s543_s14, %s2117_s16 }
 0x22c PF: > { %s851_s29 = sshll.u32 %s1817_s13, 3  ;;  %s548_s23 = scalar_lea.sflag [#allocation3], %s1817_s13 }
 0x22d   : > { %s547_s8 = scalar_lea.vmem [#allocation2], %s851_s29 }
 0x22e   : > { %1562 = dma.done.wait %s548_s23, 128 }
 0x22f   : > { %1563 = vsyncadd %s548_s23, 4294967168  ;;  %s2399_s9 = sld [smem:[#allocation61_spill]]  ;;  %s2400_s27 = sld [smem:[#allocation62_spill]]  ;;  %v552_v0 = vld [vmem:[%s547_s8] sm:$0xff] }
 0x230   : > { %s2401_s15 = sld [smem:[#allocation73_spill]]  ;;  %s2402_s26 = sld [smem:[#allocation72_spill]] }
 0x231   : > { %s2403_s21 = sld [smem:[#allocation57_spill]]  ;;  %s2404_s2 = sld [smem:[#allocation68_spill]] }
 0x232   : > { %s2407_s12 = sld [smem:[#allocation75_spill]]  ;;  %s1622_s28 = smov [#allocation9]  }
 0x233   : > { %s1488_s6 = sshll.u32 %s1622_s28, 4  ;;  %s1489_s6 = int_to_ptr.vmem [resolvable:$false] %s1488_s6 }
 0x234   : > { %s1490_s3 = scalar_lea.vmem %s1489_s6, 256 }
 0x235   : > { %s853_s18 = sshll.u32 %s2399_s9, 1 }
 0x236   : > { %s568_s25 = sadd.s32 %s2400_s27, %s853_s18  ;;  %s2405_s7 = scalar_lea.vmem [#allocation9], %s2401_s15 }
 0x237   : > { %s854_s22 = sshll.u32 %s568_s25, 7  ;;  %s572_s16 = sshll.u32 %s2405_s7, 4  ;;  %s2275_s16 = int_to_ptr.vmem [resolvable:$true] %s572_s16 }
 0x238   : > { %s2406_s17 = scalar_lea.vmem [#allocation6], %s2402_s26  ;;  %s2273_s5 = scalar_lea.hbm %s2407_s12, %s854_s22 }
 0x239   : > { %v553_v1 = vld [vmem:[%s2406_s17] sm:$0xff]  ;;  %s2408_s20 = smov %s2405_s7  ;;  %s2409_s24 = sand.u32 1, %s2403_s21  }
 0x23a   : > { %v554_v2 = vadd.f32 %v553_v1, %v552_v0  ;;  %s557_s14 = scalar_lea.sflag [#allocation8], %s2409_s24  ;;  %s1484_s19 = scalar_lea.vmem %s2275_s16, 128 }
 0x23b   : > { %p1485_p10 = scmp.ne.s32.totalorder %s2275_s16, %s1484_s19  ;;  %p2410_p8 = scmp.ne.s32.totalorder %s2404_s2, 0 }
 0x23c   : > { %555 = vst [vmem:[%s2408_s20] sm:$0xff] %v554_v2  ;;  %p1491_p5 = scmp.lt.s32.totalorder %s2275_s16, %s1489_s6  ;;  %p1492_p0 = scmp.lt.s32.totalorder %s1490_s3, %s1484_s19 }
 0x23d   : > { %p1486_p6 = pnand %p1485_p10, %p2410_p8 }
 0x23e   : > { %p1493_p2 = por %p1492_p0, %p1491_p5 }
 0x23f   : > { %p1487_p12 = pneg %p1486_p6 }
 0x241   : > { %p1494_p11 = pnand %p1493_p2, %p1487_p12 }
 0x243   : > { %1497 = shalt.err (!%p1494_p11)
}
 0x244   : > { %s1498_s11 = scalar_lea.hbm %s2273_s5, 128  ;;  %s1502_s10 = scalar_lea.hbm %s2407_s12, 512 }
 0x245   : > { %p1499_p13 = scmp.ne.s32.totalorder %s2273_s5, %s1498_s11  ;;  %p1503_p1 = scmp.lt.u32.totalorder %s2273_s5, %s2407_s12 }
 0x246   : > { %p1504_p4 = scmp.lt.u32.totalorder %s1502_s10, %s1498_s11  ;;  %p1506_p10 = scmp.lt.u32.totalorder %s1498_s11, %s2273_s5 }
 0x247   : > { %p1500_p3 = pnand %p1499_p13, %p2410_p8 }
 0x248   : > { %p1505_p7 = por %p1504_p4, %p1503_p1 }
 0x249   : > { %p1501_p9 = pneg %p1500_p3 }
 0x24a   : > { %p1507_p6 = por %p1506_p10, %p1505_p7 }
 0x24c   : > { %p1508_p12 = pnand %p1507_p6, %p1501_p9 }
 0x24e   : > { %1511 = shalt.err (!%p1508_p12)
}
 0x24f   : > { %918 = dma.vmem_to_hbm [thread:$0]  (%p2410_p8), %s2275_s16, 128, %s2273_s5, %s557_s14  }
 0x250 PF: > { %s2411_s23 = sld [smem:[#allocation65_spill]]  ;;  %s2412_s9 = sld [smem:[#allocation56_spill]] }
 0x251   : > { %s2413_s27 = sld [smem:[#allocation71_spill]] }
 0x256   : > { %p930_p5 = scmp.ge.s32.totalorder %s2411_s23, 2  ;;  %s584_s15 = sand.u32 1, %s2412_s9  }
 0x257   : > { %p2414_p0 = scmp.ne.s32.totalorder %s2413_s27, 0  ;;  %s585_s26 = scalar_lea.sflag [#allocation8], %s584_s15 }
 0x259   : > { %p925_p2 = pnand %p930_p5, %p2414_p0 }
 0x25b   : > { %1565 = dma.done.wait (!%p925_p2), %s585_s26, 128  }
 0x25c   : > { %1567 = vsyncadd (!%p925_p2), %s585_s26, 4294967168  ;;  %s23_s4 = sadd.s32 1, %s2411_s23   ;;  %s2415_s22 = sld [smem:[#allocation57_spill]] }
 0x25d   : > { %p20_p11 = scmp.ge.s32.totalorder %s23_s4, 6   ;;  %s2416_s23 = sld [smem:[#allocation58_spill]] }
 0x25e   : > { %s2417_s24 = sld [smem:[#allocation70_spill]]  ;;  %s2418_s25 = sld [smem:[#allocation59_spill]] }
 0x25f   : > { %s2419_s26 = sld [smem:[#allocation60_spill]]  ;;  %s2420_s27 = sld [smem:[#allocation69_spill]] }
 0x260   : > { %s2421_s0 = sld [smem:[#allocation63_spill]]  ;;  %s2422_s28 = sld [smem:[#allocation64_spill]] }
 0x261   : > { %s2423_s29 = sld [smem:[#allocation66_spill]]  ;;  %s2424_s30 = sld [smem:[#allocation67_spill]] }
 0x262   :  { %22 = sbr.rel (!%p20_p11) target bundleno = 22 (0x16), region = 176 }
 0x269   :  { %590 = vsyncpa [#allocation7], 1 }
 0x26a   :  { %592 = vsyncpa [#allocation7 + $0x1], 1 }
 0x26b   :  { %593 = vsyncpa [#allocation8], 1 }
 0x26c   :  { %595 = vsyncpa [#allocation8 + $0x1], 1 }
 0x26d   :  { %596 = vsyncmov [#allocation3] }
 0x270   :  { %s597_s21 = vpop.sfrf %596 }
 0x271   :  { %p857_p8 = scmp.ne.s32.totalorder %s597_s21, 0 }
 0x273   :  { %601 = shalt.err (%p857_p8)  }
 0x274   :  { %603 = vsyncmov [#allocation3 + $0x1] }
 0x277   :  { %s604_s2 = vpop.sfrf %603 }
 0x278   :  { %p858_p13 = scmp.ne.s32.totalorder %s604_s2, 0 }
 0x27a   :  { %608 = shalt.err (%p858_p13)  }

</bundles_post_ra>
